<compile_context>
chip_gen: v5e
topology: v5e:2x2
jax: 0.10.0
libtpu: 0.0.40
codegen_flags: <defaults>
</compile_context>

<pallas_src>
import functools

import numpy as np
import jax
import jax.numpy as jnp
from jax.experimental import pallas as pl
from jax.experimental.pallas import tpu as pltpu


def _wf_kernel(x0_ref, I2_ref,
               Ar_ref, Ai_ref, Be_ref, BeJ_ref,
               Cr_ref, Ci_ref, De_ref, DeJ_ref,
               L2r_ref, L2i_ref, R2e_ref, R2eJ_ref,
               L3r_ref, L3i_ref, R3e_ref, R3eJ_ref,
               Pr2_ref, Pi2_ref, J2_ref,
               g_ref,
               x_s, dma_sem, *, mu, mm_dtype):
    k = pl.program_id(0)

    # Channel 0: kick off the one-shot HBM->VMEM copy of the initial object
    # slab; the operator loads below overlap with it, the wait comes after.
    @pl.when(k == 0)
    def _():
        pltpu.make_async_copy(x0_ref, x_s, dma_sem).start()

    def dot(a, b):
        if mm_dtype is not None:
            a = a.astype(mm_dtype)
        return jnp.dot(a, b, preferred_element_type=jnp.float32)

    # Per-channel spectral crop / embed operators (pipelined along the grid).
    Ar, Ai = Ar_ref[0], Ai_ref[0]            # (h, No0)
    Be, BeJ = Be_ref[0], BeJ_ref[0]          # (2*b*No1, 2*b*w)
    Cr, Ci = Cr_ref[0], Ci_ref[0]            # (No0, h)
    De, DeJ = De_ref[0], DeJ_ref[0]          # (2*b*w, 2*b*No1)
    I2 = I2_ref[0]                           # (h, 2*b*w)   [I | I]
    # Channel-independent operators (constant index_map -> fetched once).
    L2r, L2i = L2r_ref[...], L2i_ref[...]    # (h, h)
    R2e, R2eJ = R2e_ref[...], R2eJ_ref[...]  # (2*b*w, 2*b*w)
    L3r, L3i = L3r_ref[...], L3i_ref[...]
    R3e, R3eJ = R3e_ref[...], R3eJ_ref[...]
    Pr2, Pi2 = Pr2_ref[...], Pi2_ref[...]    # (h, 2*b*w) tiled pupil
    J2 = J2_ref[...]                         # (2*b*w, 2*b*w): Xcat @ J2 == cat(i*X)

    @pl.when(k == 0)
    def _():
        pltpu.make_async_copy(x0_ref, x_s, dma_sem).wait()

    x = x_s[...]                             # (No0, 2*b*No1)  [xr | xi]

    # psi = fftshift(fft2(x))[crop] * P  ==  (A_k x B~_k) * P
    t1 = dot(Ar, x)                          # (h, 2*b*No1)
    t2 = dot(Ai, x)
    psi = dot(t1, Be) + dot(t2, BeJ)         # (h, 2*b*w)
    psi = Pr2 * psi + Pi2 * dot(psi, J2)     # elementwise pupil

    # inv_psik = ifft2(ifftshift(psi)) * hw/(No0*No1)  ==  L2 psi R~2
    u1 = dot(L2r, psi)
    u2 = dot(L2i, psi)
    inv = dot(u1, R2e) + dot(u2, R2eJ)       # (h, 2*b*w)

    # diff = (|inv_psik|^2 - I_k) * inv_psik
    invJ = dot(inv, J2)                      # [-inv_i | inv_r]
    m = inv * inv + invJ * invJ - I2         # [|inv|^2 - I | |inv|^2 - I]
    d = m * inv

    # G = fftshift(fft2(diff)) * P  ==  (L3 d R~3) * P
    e1 = dot(L3r, d)
    e2 = dot(L3i, d)
    gg = dot(e1, R3e) + dot(e2, R3eJ)        # (h, 2*b*w)
    gg = Pr2 * gg + Pi2 * dot(gg, J2)

    # invZ = ifft2(ifftshift(embed(G))) * No0*No1/hw  ==  C_k G D~_k
    s1 = dot(gg, De)                         # (h, 2*b*No1)
    s2 = dot(gg, DeJ)
    z = dot(Cr, s1) + dot(Ci, s2)            # (No0, 2*b*No1)

    g_ref[0] = z                             # lane-dense store, one block / channel
    x_s[...] = x - mu * z                    # carry x to the next channel


def _vmem_limit_bytes():
    """Chip-aware scoped-VMEM limit (defaults are far below physical)."""
    try:
        cap = getattr(pltpu.get_tpu_info(), "vmem_capacity_bytes", None)
        if cap:
            return int(min(cap * 3 // 4, 112 * 1024 * 1024))
    except Exception:
        pass
    return 48 * 1024 * 1024   # safe on v5e / v6e / v7x


def forward_layer_wf(x, I, Ns, P, N, N_obj, mu=0.01, matmul_dtype=None):
    """Pallas equivalent of forwardLayerWF.forward. Returns (b, ch, No0, No1) complex64.

    matmul_dtype: None keeps f32 operands; jnp.bfloat16 raises MXU throughput on
    all of v5e/v6e/v7x (formulation has no Gauss-trick cancellation, elementwise
    pupil/intensity math and the carried x stay f32). Validate accuracy before use.
    """
    b, ch, h, w = I.shape
    No0, No1 = int(N_obj[0]), int(N_obj[1])
    Nh, Nv = int(N[0]), int(N[1])
    assert h == 2 * Nh and w == 2 * Nv, "crop size must match measurement size"
    assert No0 % 2 == 0 and No1 % 2 == 0 and h % 2 == 0 and w % 2 == 0

    n1, n2 = b * No1, b * w

    # TODO(synk): Ns is pulled to host, so the wrapper is not jittable w.r.t. a
    # traced Ns; use scalar-prefetched offsets + pl.ds slicing for that case.
    Ns_np = np.asarray(jax.device_get(Ns), dtype=np.float64).reshape(ch, 2)

    # ---- host-built (numpy) shifted DFT / crop / embed operators --------------
    def dftmat(M):
        n = np.arange(M)
        return np.exp(-2j * np.pi * np.outer(n, n) / M)

    F0, F1, Fh, Fw = dftmat(No0), dftmat(No1), dftmat(h), dftmat(w)
    L1 = np.roll(F0, No0 // 2, axis=0)                       # fftshift(fft2) rows
    R1 = np.roll(F1, No1 // 2, axis=1)                       # fftshift(fft2) cols
    L2 = np.roll(np.conj(Fh), h // 2, axis=1) / (No0 * No1)  # ifft2(ifftshift) * hw/(No0*No1)
    R2 = np.roll(np.conj(Fw), w // 2, axis=0)
    L3 = np.roll(Fh, h // 2, axis=0)                         # fftshift(fft2) on (h, w)
    R3 = np.roll(Fw, w // 2, axis=1)
    L2p = np.roll(np.conj(F0), No0 // 2, axis=1) / (h * w)   # ifft2(ifftshift) * No0*No1/hw
    R2p = np.roll(np.conj(F1), No1 // 2, axis=0)

    def cemb(M):
        """Complex (K,N) -> real (2K,2N) acting on lane-cat [Xr | Xi] from the right."""
        Mr, Mi = np.real(M), np.imag(M)
        return np.block([[Mr, Mi], [-Mi, Mr]])

    def jmat(n):
        """(2n,2n) 'multiply by i': [Xr | Xi] @ J == [-Xi | Xr]."""
        In, Z = np.eye(n), np.zeros((n, n))
        return np.block([[Z, In], [-In, Z]])

    J1 = jmat(n1)
    J2 = jmat(n2)
    eye_b = np.eye(b)
    cen0 = (No0 // 2, No1 // 2)

    Ar_l, Ai_l, Be_l, BeJ_l, Cr_l, Ci_l, De_l, DeJ_l = ([] for _ in range(8))
    for k in range(ch):
        kxl = int(round(cen0[0] + Ns_np[k, 0] - Nh))
        kyl = int(round(cen0[1] + Ns_np[k, 1] - Nv))
        Ak = L1[kxl:kxl + h, :]                 # (h, No0)  spectral crop rows
        Bk = R1[:, kyl:kyl + w]                 # (No1, w)  spectral crop cols
        Ck = L2p[:, kxl:kxl + h]                # (No0, h)  spectral embed rows
        Dk = R2p[kyl:kyl + w, :]                # (w, No1)  spectral embed cols
        Be = cemb(np.kron(eye_b, Bk))           # (2n1, 2n2) block-diag over batch
        De = cemb(np.kron(eye_b, Dk))           # (2n2, 2n1)
        Ar_l.append(np.real(Ak)); Ai_l.append(np.imag(Ak))
        Cr_l.append(np.real(Ck)); Ci_l.append(np.imag(Ck))
        Be_l.append(Be); BeJ_l.append(J1 @ Be)
        De_l.append(De); DeJ_l.append(J2 @ De)

    R2e = cemb(np.kron(eye_b, R2)); R2eJ = J2 @ R2e      # (2n2, 2n2)
    R3e = cemb(np.kron(eye_b, R3)); R3eJ = J2 @ R3e

    op_dtype = jnp.float32 if matmul_dtype is None else matmul_dtype

    def dev(a):
        return jnp.asarray(np.ascontiguousarray(a), dtype=op_dtype)

    Ar, Ai = dev(np.stack(Ar_l)), dev(np.stack(Ai_l))        # (ch, h, No0)
    Bemb, BembJ = dev(np.stack(Be_l)), dev(np.stack(BeJ_l))  # (ch, 2n1, 2n2)
    Cr, Ci = dev(np.stack(Cr_l)), dev(np.stack(Ci_l))        # (ch, No0, h)
    Demb, DembJ = dev(np.stack(De_l)), dev(np.stack(DeJ_l))  # (ch, 2n2, 2n1)
    L2r, L2i = dev(np.real(L2)), dev(np.imag(L2))
    L3r, L3i = dev(np.real(L3)), dev(np.imag(L3))
    R2e_d, R2eJ_d = dev(R2e), dev(R2eJ)
    R3e_d, R3eJ_d = dev(R3e), dev(R3eJ)
    J2_d = dev(J2)

    # Pupil, tiled lane-dense over batch and both halves (J2 carries the sign).
    Pr_t = jnp.tile(jnp.real(P).astype(jnp.float32), (1, b))        # (h, n2)
    Pi_t = jnp.tile(jnp.imag(P).astype(jnp.float32), (1, b))
    Pr2 = jnp.concatenate([Pr_t, Pr_t], axis=1)                     # (h, 2n2)
    Pi2 = jnp.concatenate([Pi_t, Pi_t], axis=1)

    # Lane-dense intensity: (ch, h, 2*b*w) = [batch-blocked I | same].
    I_slab = jnp.transpose(I.astype(jnp.float32), (1, 2, 0, 3)).reshape(ch, h, n2)
    I2_arr = jnp.concatenate([I_slab, I_slab], axis=-1)

    # Initial object estimate, lane-concatenated [real | imag], batch on lanes.
    xr = jnp.transpose(jnp.real(x).astype(jnp.float32), (1, 0, 2)).reshape(No0, n1)
    xi = jnp.transpose(jnp.imag(x).astype(jnp.float32), (1, 0, 2)).reshape(No0, n1)
    x0cat = jnp.concatenate([xr, xi], axis=1)                       # (No0, 2n1)

    chan3 = lambda k: (k, 0, 0)
    const2 = lambda k: (0, 0)

    in_specs = [
        pl.BlockSpec(memory_space=pl.ANY),            # x0 (one-shot manual DMA)
        pl.BlockSpec((1, h, 2 * n2), chan3),          # I2
        pl.BlockSpec((1, h, No0), chan3),             # A real
        pl.BlockSpec((1, h, No0), chan3),             # A imag
        pl.BlockSpec((1, 2 * n1, 2 * n2), chan3),     # B embed
        pl.BlockSpec((1, 2 * n1, 2 * n2), chan3),     # J1 @ B embed
        pl.BlockSpec((1, No0, h), chan3),             # C real
        pl.BlockSpec((1, No0, h), chan3),             # C imag
        pl.BlockSpec((1, 2 * n2, 2 * n1), chan3),     # D embed
        pl.BlockSpec((1, 2 * n2, 2 * n1), chan3),     # J2 @ D embed
        pl.BlockSpec((h, h), const2),                 # L2 real
        pl.BlockSpec((h, h), const2),                 # L2 imag
        pl.BlockSpec((2 * n2, 2 * n2), const2),       # R2 embed
        pl.BlockSpec((2 * n2, 2 * n2), const2),       # J2 @ R2 embed
        pl.BlockSpec((h, h), const2),                 # L3 real
        pl.BlockSpec((h, h), const2),                 # L3 imag
        pl.BlockSpec((2 * n2, 2 * n2), const2),       # R3 embed
        pl.BlockSpec((2 * n2, 2 * n2), const2),       # J2 @ R3 embed
        pl.BlockSpec((h, 2 * n2), const2),            # pupil real (tiled)
        pl.BlockSpec((h, 2 * n2), const2),            # pupil imag (tiled)
        pl.BlockSpec((2 * n2, 2 * n2), const2),       # J2 ("multiply by i")
    ]
    out_specs = pl.BlockSpec((1, No0, 2 * n1), chan3)
    out_shape = jax.ShapeDtypeStruct((ch, No0, 2 * n1), jnp.float32)

    gcat = pl.pallas_call(
        functools.partial(_wf_kernel, mu=float(mu), mm_dtype=matmul_dtype),
        out_shape=out_shape,
        grid_spec=pltpu.PrefetchScalarGridSpec(
            num_scalar_prefetch=0,
            grid=(ch,),
            in_specs=in_specs,
            out_specs=out_specs,
            scratch_shapes=[pltpu.VMEM((No0, 2 * n1), jnp.float32),
                            pltpu.SemaphoreType.DMA],
        ),
        compiler_params=pltpu.CompilerParams(
            dimension_semantics=("arbitrary",),    # x is carried across channels
            vmem_limit_bytes=_vmem_limit_bytes()),
    )(x0cat, I2_arr, Ar, Ai, Bemb, BembJ, Cr, Ci, Demb, DembJ,
      L2r, L2i, R2e_d, R2eJ_d, L3r, L3i, R3e_d, R3eJ_d, Pr2, Pi2, J2_d)

    # Unpack lane-dense (ch, No0, 2*b*No1) slab back to (b, ch, No0, No1) complex.
    gr = gcat[:, :, :n1].reshape(ch, No0, b, No1).transpose(2, 0, 1, 3)
    gi = gcat[:, :, n1:].reshape(ch, No0, b, No1).transpose(2, 0, 1, 3)
    return jax.lax.complex(gr, gi)


def reference_forward_np(x, I, Ns, P, N, N_obj, mu=0.01):
    """Straight numpy port of the PyTorch forward (float64, for validation)."""
    x = np.asarray(x, dtype=np.complex128)
    I = np.asarray(I, dtype=np.float64)
    P = np.asarray(P, dtype=np.complex128)
    Ns = np.asarray(Ns, dtype=np.float64).reshape(-1, 2)
    b, ch, h, w = I.shape
    No0, No1 = int(N_obj[0]), int(N_obj[1])
    cen0 = (No0 // 2, No1 // 2)
    grad = np.zeros((b, ch, No0, No1), dtype=np.complex128)
    for k in range(ch):
        xFT = np.fft.fftshift(np.fft.fft2(x), axes=(1, 2))
        cenx = cen0[0] + Ns[k, 0]
        ceny = cen0[1] + Ns[k, 1]
        kxl = int(round(cenx - N[0])); kxh = int(round(cenx + N[0]))
        kyl = int(round(ceny - N[1])); kyh = int(round(ceny + N[1]))
        psi = xFT[:, kxl:kxh, kyl:kyh] * P
        inv_psik = np.fft.ifft2(np.fft.ifftshift(psi, axes=(1, 2))) * (h * w / (No0 * No1))
        I_est = np.abs(inv_psik) ** 2
        diff = (I_est - I[:, k]) * inv_psik
        Z = np.zeros((b, No0, No1), dtype=np.complex128)
        Z[:, kxl:kxh, kyl:kyh] = np.fft.fftshift(np.fft.fft2(diff), axes=(1, 2)) * P
        invZ = np.fft.ifft2(np.fft.ifftshift(Z, axes=(1, 2))) * (No0 * No1 / (h * w))
        grad[:, k] = invZ
        x = x - mu * invZ
    return grad


if __name__ == "__main__":
    b, ch = 2, 4
    N_obj = (32, 32)          # object grid
    N = (8, 8)                # half crop size -> h = w = 16
    h, w = 2 * N[0], 2 * N[1]
    mu = 0.01

    key = jax.random.PRNGKey(0)
    k1, k2, k3, k4 = jax.random.split(key, 4)
    x = (jax.random.normal(k1, (b, N_obj[0], N_obj[1]), jnp.float32)
         + 1j * jax.random.normal(k2, (b, N_obj[0], N_obj[1]), jnp.float32)).astype(jnp.complex64)
    I = jax.random.uniform(k3, (b, ch, h, w), jnp.float32)

    # Deterministic circular pupil (CTF) with a mild random phase.
    yy, xx = jnp.meshgrid(jnp.arange(h) - h / 2 + 0.5,
                          jnp.arange(w) - w / 2 + 0.5, indexing="ij")
    rad = jnp.sqrt(yy ** 2 + xx ** 2)
    mask = (rad <= (min(h, w) / 2)).astype(jnp.float32)
    phase = 0.1 * jax.random.normal(k4, (h, w), jnp.float32)
    P = (mask * jnp.exp(1j * phase)).astype(jnp.complex64)

    # LED / illumination spectral shifts (kept inside the object spectrum).
    Ns = jnp.array([[0.0, 0.0], [2.0, -2.0], [-3.0, 1.0], [4.0, 3.0]], jnp.float32)

    grad = forward_layer_wf(x, I, Ns, P, N, N_obj, mu=mu)
    grad = jax.block_until_ready(grad)

    ref = reference_forward_np(jax.device_get(x), jax.device_get(I),
                               jax.device_get(Ns), jax.device_get(P),
                               N, N_obj, mu=mu)
    err = float(np.max(np.abs(np.asarray(jax.device_get(grad)) - ref)))
    scale = float(np.max(np.abs(ref))) + 1e-30
    assert err / scale < 5e-2, f"kernel/reference mismatch: rel err {err / scale:.3e}"
    print("KERNEL_OK")
</pallas_src>

<mosaic_0001>
module attributes {stable_mosaic.version = 11 : i64} {
  func.func @_wf_kernel(%arg0: i32, %arg1: memref<32x128xf32, #tpu.memory_space<any>>, %arg2: memref<1x16x64xf32, #tpu.memory_space<vmem>>, %arg3: memref<1x16x32xf32, #tpu.memory_space<vmem>>, %arg4: memref<1x16x32xf32, #tpu.memory_space<vmem>>, %arg5: memref<1x128x64xf32, #tpu.memory_space<vmem>>, %arg6: memref<1x128x64xf32, #tpu.memory_space<vmem>>, %arg7: memref<1x32x16xf32, #tpu.memory_space<vmem>>, %arg8: memref<1x32x16xf32, #tpu.memory_space<vmem>>, %arg9: memref<1x64x128xf32, #tpu.memory_space<vmem>>, %arg10: memref<1x64x128xf32, #tpu.memory_space<vmem>>, %arg11: memref<16x16xf32, #tpu.memory_space<vmem>>, %arg12: memref<16x16xf32, #tpu.memory_space<vmem>>, %arg13: memref<64x64xf32, #tpu.memory_space<vmem>>, %arg14: memref<64x64xf32, #tpu.memory_space<vmem>>, %arg15: memref<16x16xf32, #tpu.memory_space<vmem>>, %arg16: memref<16x16xf32, #tpu.memory_space<vmem>>, %arg17: memref<64x64xf32, #tpu.memory_space<vmem>>, %arg18: memref<64x64xf32, #tpu.memory_space<vmem>>, %arg19: memref<16x64xf32, #tpu.memory_space<vmem>>, %arg20: memref<16x64xf32, #tpu.memory_space<vmem>>, %arg21: memref<64x64xf32, #tpu.memory_space<vmem>>, %arg22: memref<1x32x128xf32, #tpu.memory_space<vmem>>, %arg23: memref<32x128xf32, #tpu.memory_space<vmem>>, %arg24: memref<!tpu.dma_semaphore, #tpu.memory_space<semaphore_mem>>) attributes {dimension_semantics = [#tpu.dimension_semantics<arbitrary>], iteration_bounds = array<i64: 4>, scalar_prefetch = 0 : i64, scratch_operands = 2 : i64, tpu.core_type = #tpu.core_type<tc>, window_params = [{}, {transform_indices = @transform_1, window_bounds = array<i64: 1, 16, 64>}, {transform_indices = @transform_2, window_bounds = array<i64: 1, 16, 32>}, {transform_indices = @transform_3, window_bounds = array<i64: 1, 16, 32>}, {transform_indices = @transform_4, window_bounds = array<i64: 1, 128, 64>}, {transform_indices = @transform_5, window_bounds = array<i64: 1, 128, 64>}, {transform_indices = @transform_6, window_bounds = array<i64: 1, 32, 16>}, {transform_indices = @transform_7, window_bounds = array<i64: 1, 32, 16>}, {transform_indices = @transform_8, window_bounds = array<i64: 1, 64, 128>}, {transform_indices = @transform_9, window_bounds = array<i64: 1, 64, 128>}, {pipeline_mode = #tpu.pipeline_mode<synchronous>, transform_indices = @transform_10, window_bounds = array<i64: 16, 16>}, {pipeline_mode = #tpu.pipeline_mode<synchronous>, transform_indices = @transform_11, window_bounds = array<i64: 16, 16>}, {pipeline_mode = #tpu.pipeline_mode<synchronous>, transform_indices = @transform_12, window_bounds = array<i64: 64, 64>}, {pipeline_mode = #tpu.pipeline_mode<synchronous>, transform_indices = @transform_13, window_bounds = array<i64: 64, 64>}, {pipeline_mode = #tpu.pipeline_mode<synchronous>, transform_indices = @transform_14, window_bounds = array<i64: 16, 16>}, {pipeline_mode = #tpu.pipeline_mode<synchronous>, transform_indices = @transform_15, window_bounds = array<i64: 16, 16>}, {pipeline_mode = #tpu.pipeline_mode<synchronous>, transform_indices = @transform_16, window_bounds = array<i64: 64, 64>}, {pipeline_mode = #tpu.pipeline_mode<synchronous>, transform_indices = @transform_17, window_bounds = array<i64: 64, 64>}, {pipeline_mode = #tpu.pipeline_mode<synchronous>, transform_indices = @transform_18, window_bounds = array<i64: 16, 64>}, {pipeline_mode = #tpu.pipeline_mode<synchronous>, transform_indices = @transform_19, window_bounds = array<i64: 16, 64>}, {pipeline_mode = #tpu.pipeline_mode<synchronous>, transform_indices = @transform_20, window_bounds = array<i64: 64, 64>}, {transform_indices = @transform_21, window_bounds = array<i64: 1, 32, 128>}]} {
    %c0_i32 = arith.constant 0 : i32
    %0 = arith.cmpi eq, %arg0, %c0_i32 : i32
    %1 = arith.extui %0 : i1 to i32
    %c0_i32_0 = arith.constant 0 : i32
    %2 = arith.cmpi ne, %1, %c0_i32_0 : i32
    scf.if %2 {
      tpu.enqueue_dma source(%arg1 : memref<32x128xf32, #tpu.memory_space<any>>) target(%arg23 : memref<32x128xf32, #tpu.memory_space<vmem>>) target_semaphore(%arg24 : memref<!tpu.dma_semaphore, #tpu.memory_space<semaphore_mem>>)
    } else {
    }
    %c0 = arith.constant 0 : index
    %c0_1 = arith.constant 0 : index
    %c0_2 = arith.constant 0 : index
    %3 = vector.load %arg3[%c0, %c0_1, %c0_2] : memref<1x16x32xf32, #tpu.memory_space<vmem>>, vector<1x16x32xf32>
    %4 = vector.shape_cast %3 : vector<1x16x32xf32> to vector<16x32xf32>
    %c0_3 = arith.constant 0 : index
    %c0_4 = arith.constant 0 : index
    %c0_5 = arith.constant 0 : index
    %5 = vector.load %arg4[%c0_3, %c0_4, %c0_5] : memref<1x16x32xf32, #tpu.memory_space<vmem>>, vector<1x16x32xf32>
    %6 = vector.shape_cast %5 : vector<1x16x32xf32> to vector<16x32xf32>
    %c0_6 = arith.constant 0 : index
    %c0_7 = arith.constant 0 : index
    %c0_8 = arith.constant 0 : index
    %7 = vector.load %arg5[%c0_6, %c0_7, %c0_8] : memref<1x128x64xf32, #tpu.memory_space<vmem>>, vector<1x128x64xf32>
    %8 = vector.shape_cast %7 : vector<1x128x64xf32> to vector<128x64xf32>
    %c0_9 = arith.constant 0 : index
    %c0_10 = arith.constant 0 : index
    %c0_11 = arith.constant 0 : index
    %9 = vector.load %arg6[%c0_9, %c0_10, %c0_11] : memref<1x128x64xf32, #tpu.memory_space<vmem>>, vector<1x128x64xf32>
    %10 = vector.shape_cast %9 : vector<1x128x64xf32> to vector<128x64xf32>
    %c0_12 = arith.constant 0 : index
    %c0_13 = arith.constant 0 : index
    %c0_14 = arith.constant 0 : index
    %11 = vector.load %arg7[%c0_12, %c0_13, %c0_14] : memref<1x32x16xf32, #tpu.memory_space<vmem>>, vector<1x32x16xf32>
    %12 = vector.shape_cast %11 : vector<1x32x16xf32> to vector<32x16xf32>
    %c0_15 = arith.constant 0 : index
    %c0_16 = arith.constant 0 : index
    %c0_17 = arith.constant 0 : index
    %13 = vector.load %arg8[%c0_15, %c0_16, %c0_17] : memref<1x32x16xf32, #tpu.memory_space<vmem>>, vector<1x32x16xf32>
    %14 = vector.shape_cast %13 : vector<1x32x16xf32> to vector<32x16xf32>
    %c0_18 = arith.constant 0 : index
    %c0_19 = arith.constant 0 : index
    %c0_20 = arith.constant 0 : index
    %15 = vector.load %arg9[%c0_18, %c0_19, %c0_20] : memref<1x64x128xf32, #tpu.memory_space<vmem>>, vector<1x64x128xf32>
    %16 = vector.shape_cast %15 : vector<1x64x128xf32> to vector<64x128xf32>
    %c0_21 = arith.constant 0 : index
    %c0_22 = arith.constant 0 : index
    %c0_23 = arith.constant 0 : index
    %17 = vector.load %arg10[%c0_21, %c0_22, %c0_23] : memref<1x64x128xf32, #tpu.memory_space<vmem>>, vector<1x64x128xf32>
    %18 = vector.shape_cast %17 : vector<1x64x128xf32> to vector<64x128xf32>
    %c0_24 = arith.constant 0 : index
    %c0_25 = arith.constant 0 : index
    %c0_26 = arith.constant 0 : index
    %19 = vector.load %arg2[%c0_24, %c0_25, %c0_26] : memref<1x16x64xf32, #tpu.memory_space<vmem>>, vector<1x16x64xf32>
    %20 = vector.shape_cast %19 : vector<1x16x64xf32> to vector<16x64xf32>
    %c0_27 = arith.constant 0 : index
    %c0_28 = arith.constant 0 : index
    %21 = vector.load %arg11[%c0_27, %c0_28] : memref<16x16xf32, #tpu.memory_space<vmem>>, vector<16x16xf32>
    %c0_29 = arith.constant 0 : index
    %c0_30 = arith.constant 0 : index
    %22 = vector.load %arg12[%c0_29, %c0_30] : memref<16x16xf32, #tpu.memory_space<vmem>>, vector<16x16xf32>
    %c0_31 = arith.constant 0 : index
    %c0_32 = arith.constant 0 : index
    %23 = vector.load %arg13[%c0_31, %c0_32] : memref<64x64xf32, #tpu.memory_space<vmem>>, vector<64x64xf32>
    %c0_33 = arith.constant 0 : index
    %c0_34 = arith.constant 0 : index
    %24 = vector.load %arg14[%c0_33, %c0_34] : memref<64x64xf32, #tpu.memory_space<vmem>>, vector<64x64xf32>
    %c0_35 = arith.constant 0 : index
    %c0_36 = arith.constant 0 : index
    %25 = vector.load %arg15[%c0_35, %c0_36] : memref<16x16xf32, #tpu.memory_space<vmem>>, vector<16x16xf32>
    %c0_37 = arith.constant 0 : index
    %c0_38 = arith.constant 0 : index
    %26 = vector.load %arg16[%c0_37, %c0_38] : memref<16x16xf32, #tpu.memory_space<vmem>>, vector<16x16xf32>
    %c0_39 = arith.constant 0 : index
    %c0_40 = arith.constant 0 : index
    %27 = vector.load %arg17[%c0_39, %c0_40] : memref<64x64xf32, #tpu.memory_space<vmem>>, vector<64x64xf32>
    %c0_41 = arith.constant 0 : index
    %c0_42 = arith.constant 0 : index
    %28 = vector.load %arg18[%c0_41, %c0_42] : memref<64x64xf32, #tpu.memory_space<vmem>>, vector<64x64xf32>
    %c0_43 = arith.constant 0 : index
    %c0_44 = arith.constant 0 : index
    %29 = vector.load %arg19[%c0_43, %c0_44] : memref<16x64xf32, #tpu.memory_space<vmem>>, vector<16x64xf32>
    %c0_45 = arith.constant 0 : index
    %c0_46 = arith.constant 0 : index
    %30 = vector.load %arg20[%c0_45, %c0_46] : memref<16x64xf32, #tpu.memory_space<vmem>>, vector<16x64xf32>
    %c0_47 = arith.constant 0 : index
    %c0_48 = arith.constant 0 : index
    %31 = vector.load %arg21[%c0_47, %c0_48] : memref<64x64xf32, #tpu.memory_space<vmem>>, vector<64x64xf32>
    %c0_i32_49 = arith.constant 0 : i32
    %32 = arith.cmpi eq, %arg0, %c0_i32_49 : i32
    %33 = arith.extui %32 : i1 to i32
    %c0_i32_50 = arith.constant 0 : i32
    %34 = arith.cmpi ne, %33, %c0_i32_50 : i32
    scf.if %34 {
      tpu.wait_dma2 semaphore(%arg24 : memref<!tpu.dma_semaphore, #tpu.memory_space<semaphore_mem>>) src(%arg1 : memref<32x128xf32, #tpu.memory_space<any>>) dst(%arg23 : memref<32x128xf32, #tpu.memory_space<vmem>>)
    } else {
    }
    %c0_51 = arith.constant 0 : index
    %c0_52 = arith.constant 0 : index
    %35 = vector.load %arg23[%c0_51, %c0_52] : memref<32x128xf32, #tpu.memory_space<vmem>>, vector<32x128xf32>
    %cst = arith.constant dense<0.000000e+00> : vector<16x128xf32>
    %36 = tpu.matmul %4, %35, %cst {dimension_numbers = #tpu.dot_dimension_numbers<[1], [0], [0], [1], [0, 0, 1, 1], [], []>} : vector<16x32xf32>, vector<32x128xf32>, vector<16x128xf32> -> vector<16x128xf32>
    %cst_53 = arith.constant dense<0.000000e+00> : vector<16x128xf32>
    %37 = tpu.matmul %6, %35, %cst_53 {dimension_numbers = #tpu.dot_dimension_numbers<[1], [0], [0], [1], [0, 0, 1, 1], [], []>} : vector<16x32xf32>, vector<32x128xf32>, vector<16x128xf32> -> vector<16x128xf32>
    %cst_54 = arith.constant dense<0.000000e+00> : vector<16x64xf32>
    %38 = tpu.matmul %36, %8, %cst_54 {dimension_numbers = #tpu.dot_dimension_numbers<[1], [0], [0], [1], [0, 0, 1, 1], [], []>} : vector<16x128xf32>, vector<128x64xf32>, vector<16x64xf32> -> vector<16x64xf32>
    %cst_55 = arith.constant dense<0.000000e+00> : vector<16x64xf32>
    %39 = tpu.matmul %37, %10, %cst_55 {dimension_numbers = #tpu.dot_dimension_numbers<[1], [0], [0], [1], [0, 0, 1, 1], [], []>} : vector<16x128xf32>, vector<128x64xf32>, vector<16x64xf32> -> vector<16x64xf32>
    %40 = arith.addf %38, %39 : vector<16x64xf32>
    %41 = arith.mulf %29, %40 : vector<16x64xf32>
    %cst_56 = arith.constant dense<0.000000e+00> : vector<16x64xf32>
    %42 = tpu.matmul %40, %31, %cst_56 {dimension_numbers = #tpu.dot_dimension_numbers<[1], [0], [0], [1], [0, 0, 1, 1], [], []>} : vector<16x64xf32>, vector<64x64xf32>, vector<16x64xf32> -> vector<16x64xf32>
    %43 = arith.mulf %30, %42 : vector<16x64xf32>
    %44 = arith.addf %41, %43 : vector<16x64xf32>
    %cst_57 = arith.constant dense<0.000000e+00> : vector<16x64xf32>
    %45 = tpu.matmul %21, %44, %cst_57 {dimension_numbers = #tpu.dot_dimension_numbers<[1], [0], [0], [1], [0, 0, 1, 1], [], []>} : vector<16x16xf32>, vector<16x64xf32>, vector<16x64xf32> -> vector<16x64xf32>
    %cst_58 = arith.constant dense<0.000000e+00> : vector<16x64xf32>
    %46 = tpu.matmul %22, %44, %cst_58 {dimension_numbers = #tpu.dot_dimension_numbers<[1], [0], [0], [1], [0, 0, 1, 1], [], []>} : vector<16x16xf32>, vector<16x64xf32>, vector<16x64xf32> -> vector<16x64xf32>
    %cst_59 = arith.constant dense<0.000000e+00> : vector<16x64xf32>
    %47 = tpu.matmul %45, %23, %cst_59 {dimension_numbers = #tpu.dot_dimension_numbers<[1], [0], [0], [1], [0, 0, 1, 1], [], []>} : vector<16x64xf32>, vector<64x64xf32>, vector<16x64xf32> -> vector<16x64xf32>
    %cst_60 = arith.constant dense<0.000000e+00> : vector<16x64xf32>
    %48 = tpu.matmul %46, %24, %cst_60 {dimension_numbers = #tpu.dot_dimension_numbers<[1], [0], [0], [1], [0, 0, 1, 1], [], []>} : vector<16x64xf32>, vector<64x64xf32>, vector<16x64xf32> -> vector<16x64xf32>
    %49 = arith.addf %47, %48 : vector<16x64xf32>
    %cst_61 = arith.constant dense<0.000000e+00> : vector<16x64xf32>
    %50 = tpu.matmul %49, %31, %cst_61 {dimension_numbers = #tpu.dot_dimension_numbers<[1], [0], [0], [1], [0, 0, 1, 1], [], []>} : vector<16x64xf32>, vector<64x64xf32>, vector<16x64xf32> -> vector<16x64xf32>
    %51 = arith.mulf %49, %49 : vector<16x64xf32>
    %52 = arith.mulf %50, %50 : vector<16x64xf32>
    %53 = arith.addf %51, %52 : vector<16x64xf32>
    %54 = arith.subf %53, %20 : vector<16x64xf32>
    %55 = arith.mulf %54, %49 : vector<16x64xf32>
    %cst_62 = arith.constant dense<0.000000e+00> : vector<16x64xf32>
    %56 = tpu.matmul %25, %55, %cst_62 {dimension_numbers = #tpu.dot_dimension_numbers<[1], [0], [0], [1], [0, 0, 1, 1], [], []>} : vector<16x16xf32>, vector<16x64xf32>, vector<16x64xf32> -> vector<16x64xf32>
    %cst_63 = arith.constant dense<0.000000e+00> : vector<16x64xf32>
    %57 = tpu.matmul %26, %55, %cst_63 {dimension_numbers = #tpu.dot_dimension_numbers<[1], [0], [0], [1], [0, 0, 1, 1], [], []>} : vector<16x16xf32>, vector<16x64xf32>, vector<16x64xf32> -> vector<16x64xf32>
    %cst_64 = arith.constant dense<0.000000e+00> : vector<16x64xf32>
    %58 = tpu.matmul %56, %27, %cst_64 {dimension_numbers = #tpu.dot_dimension_numbers<[1], [0], [0], [1], [0, 0, 1, 1], [], []>} : vector<16x64xf32>, vector<64x64xf32>, vector<16x64xf32> -> vector<16x64xf32>
    %cst_65 = arith.constant dense<0.000000e+00> : vector<16x64xf32>
    %59 = tpu.matmul %57, %28, %cst_65 {dimension_numbers = #tpu.dot_dimension_numbers<[1], [0], [0], [1], [0, 0, 1, 1], [], []>} : vector<16x64xf32>, vector<64x64xf32>, vector<16x64xf32> -> vector<16x64xf32>
    %60 = arith.addf %58, %59 : vector<16x64xf32>
    %61 = arith.mulf %29, %60 : vector<16x64xf32>
    %cst_66 = arith.constant dense<0.000000e+00> : vector<16x64xf32>
    %62 = tpu.matmul %60, %31, %cst_66 {dimension_numbers = #tpu.dot_dimension_numbers<[1], [0], [0], [1], [0, 0, 1, 1], [], []>} : vector<16x64xf32>, vector<64x64xf32>, vector<16x64xf32> -> vector<16x64xf32>
    %63 = arith.mulf %30, %62 : vector<16x64xf32>
    %64 = arith.addf %61, %63 : vector<16x64xf32>
    %cst_67 = arith.constant dense<0.000000e+00> : vector<16x128xf32>
    %65 = tpu.matmul %64, %16, %cst_67 {dimension_numbers = #tpu.dot_dimension_numbers<[1], [0], [0], [1], [0, 0, 1, 1], [], []>} : vector<16x64xf32>, vector<64x128xf32>, vector<16x128xf32> -> vector<16x128xf32>
    %cst_68 = arith.constant dense<0.000000e+00> : vector<16x128xf32>
    %66 = tpu.matmul %64, %18, %cst_68 {dimension_numbers = #tpu.dot_dimension_numbers<[1], [0], [0], [1], [0, 0, 1, 1], [], []>} : vector<16x64xf32>, vector<64x128xf32>, vector<16x128xf32> -> vector<16x128xf32>
    %cst_69 = arith.constant dense<0.000000e+00> : vector<32x128xf32>
    %67 = tpu.matmul %12, %65, %cst_69 {dimension_numbers = #tpu.dot_dimension_numbers<[1], [0], [0], [1], [0, 0, 1, 1], [], []>} : vector<32x16xf32>, vector<16x128xf32>, vector<32x128xf32> -> vector<32x128xf32>
    %cst_70 = arith.constant dense<0.000000e+00> : vector<32x128xf32>
    %68 = tpu.matmul %14, %66, %cst_70 {dimension_numbers = #tpu.dot_dimension_numbers<[1], [0], [0], [1], [0, 0, 1, 1], [], []>} : vector<32x16xf32>, vector<16x128xf32>, vector<32x128xf32> -> vector<32x128xf32>
    %69 = arith.addf %67, %68 : vector<32x128xf32>
    %c0_71 = arith.constant 0 : index
    %c0_72 = arith.constant 0 : index
    %c0_73 = arith.constant 0 : index
    %70 = vector.load %arg22[%c0_71, %c0_72, %c0_73] : memref<1x32x128xf32, #tpu.memory_space<vmem>>, vector<1x32x128xf32>
    %71 = vector.shape_cast %70 : vector<1x32x128xf32> to vector<32x128xf32>
    %72 = vector.shape_cast %69 : vector<32x128xf32> to vector<1x32x128xf32>
    tpu.vector_store %arg22[%c0_71, %c0_72, %c0_73], %72 {strides = array<i32>} : memref<1x32x128xf32, #tpu.memory_space<vmem>>, vector<1x32x128xf32>,
    %cst_74 = arith.constant 0.00999999977 : f32
    %73 = vector.broadcast %cst_74 : f32 to vector<32x128xf32>
    %74 = arith.mulf %73, %69 : vector<32x128xf32>
    %75 = arith.subf %35, %74 : vector<32x128xf32>
    %c0_75 = arith.constant 0 : index
    %c0_76 = arith.constant 0 : index
    %76 = vector.load %arg23[%c0_75, %c0_76] : memref<32x128xf32, #tpu.memory_space<vmem>>, vector<32x128xf32>
    tpu.vector_store %arg23[%c0_75, %c0_76], %75 {strides = array<i32>} : memref<32x128xf32, #tpu.memory_space<vmem>>, vector<32x128xf32>,
    return
  }
  func.func @transform_1(%arg0: i32) -> (i32, i32, i32) {
    %c0_i32 = arith.constant 0 : i32
    %c0_i32_0 = arith.constant 0 : i32
    %c0_i32_1 = arith.constant 0 : i32
    return %arg0, %c0_i32, %c0_i32_0 : i32, i32, i32
  }
  func.func @transform_2(%arg0: i32) -> (i32, i32, i32) {
    %c0_i32 = arith.constant 0 : i32
    %c0_i32_0 = arith.constant 0 : i32
    %c0_i32_1 = arith.constant 0 : i32
    return %arg0, %c0_i32, %c0_i32_0 : i32, i32, i32
  }
  func.func @transform_3(%arg0: i32) -> (i32, i32, i32) {
    %c0_i32 = arith.constant 0 : i32
    %c0_i32_0 = arith.constant 0 : i32
    %c0_i32_1 = arith.constant 0 : i32
    return %arg0, %c0_i32, %c0_i32_0 : i32, i32, i32
  }
  func.func @transform_4(%arg0: i32) -> (i32, i32, i32) {
    %c0_i32 = arith.constant 0 : i32
    %c0_i32_0 = arith.constant 0 : i32
    %c0_i32_1 = arith.constant 0 : i32
    return %arg0, %c0_i32, %c0_i32_0 : i32, i32, i32
  }
  func.func @transform_5(%arg0: i32) -> (i32, i32, i32) {
    %c0_i32 = arith.constant 0 : i32
    %c0_i32_0 = arith.constant 0 : i32
    %c0_i32_1 = arith.constant 0 : i32
    return %arg0, %c0_i32, %c0_i32_0 : i32, i32, i32
  }
  func.func @transform_6(%arg0: i32) -> (i32, i32, i32) {
    %c0_i32 = arith.constant 0 : i32
    %c0_i32_0 = arith.constant 0 : i32
    %c0_i32_1 = arith.constant 0 : i32
    return %arg0, %c0_i32, %c0_i32_0 : i32, i32, i32
  }
  func.func @transform_7(%arg0: i32) -> (i32, i32, i32) {
    %c0_i32 = arith.constant 0 : i32
    %c0_i32_0 = arith.constant 0 : i32
    %c0_i32_1 = arith.constant 0 : i32
    return %arg0, %c0_i32, %c0_i32_0 : i32, i32, i32
  }
  func.func @transform_8(%arg0: i32) -> (i32, i32, i32) {
    %c0_i32 = arith.constant 0 : i32
    %c0_i32_0 = arith.constant 0 : i32
    %c0_i32_1 = arith.constant 0 : i32
    return %arg0, %c0_i32, %c0_i32_0 : i32, i32, i32
  }
  func.func @transform_9(%arg0: i32) -> (i32, i32, i32) {
    %c0_i32 = arith.constant 0 : i32
    %c0_i32_0 = arith.constant 0 : i32
    %c0_i32_1 = arith.constant 0 : i32
    return %arg0, %c0_i32, %c0_i32_0 : i32, i32, i32
  }
  func.func @transform_10(%arg0: i32) -> (i32, i32) {
    %c0_i32 = arith.constant 0 : i32
    %c0_i32_0 = arith.constant 0 : i32
    %c0_i32_1 = arith.constant 0 : i32
    return %c0_i32, %c0_i32_0 : i32, i32
  }
  func.func @transform_11(%arg0: i32) -> (i32, i32) {
    %c0_i32 = arith.constant 0 : i32
    %c0_i32_0 = arith.constant 0 : i32
    %c0_i32_1 = arith.constant 0 : i32
    return %c0_i32, %c0_i32_0 : i32, i32
  }
  func.func @transform_12(%arg0: i32) -> (i32, i32) {
    %c0_i32 = arith.constant 0 : i32
    %c0_i32_0 = arith.constant 0 : i32
    %c0_i32_1 = arith.constant 0 : i32
    return %c0_i32, %c0_i32_0 : i32, i32
  }
  func.func @transform_13(%arg0: i32) -> (i32, i32) {
    %c0_i32 = arith.constant 0 : i32
    %c0_i32_0 = arith.constant 0 : i32
    %c0_i32_1 = arith.constant 0 : i32
    return %c0_i32, %c0_i32_0 : i32, i32
  }
  func.func @transform_14(%arg0: i32) -> (i32, i32) {
    %c0_i32 = arith.constant 0 : i32
    %c0_i32_0 = arith.constant 0 : i32
    %c0_i32_1 = arith.constant 0 : i32
    return %c0_i32, %c0_i32_0 : i32, i32
  }
  func.func @transform_15(%arg0: i32) -> (i32, i32) {
    %c0_i32 = arith.constant 0 : i32
    %c0_i32_0 = arith.constant 0 : i32
    %c0_i32_1 = arith.constant 0 : i32
    return %c0_i32, %c0_i32_0 : i32, i32
  }
  func.func @transform_16(%arg0: i32) -> (i32, i32) {
    %c0_i32 = arith.constant 0 : i32
    %c0_i32_0 = arith.constant 0 : i32
    %c0_i32_1 = arith.constant 0 : i32
    return %c0_i32, %c0_i32_0 : i32, i32
  }
  func.func @transform_17(%arg0: i32) -> (i32, i32) {
    %c0_i32 = arith.constant 0 : i32
    %c0_i32_0 = arith.constant 0 : i32
    %c0_i32_1 = arith.constant 0 : i32
    return %c0_i32, %c0_i32_0 : i32, i32
  }
  func.func @transform_18(%arg0: i32) -> (i32, i32) {
    %c0_i32 = arith.constant 0 : i32
    %c0_i32_0 = arith.constant 0 : i32
    %c0_i32_1 = arith.constant 0 : i32
    return %c0_i32, %c0_i32_0 : i32, i32
  }
  func.func @transform_19(%arg0: i32) -> (i32, i32) {
    %c0_i32 = arith.constant 0 : i32
    %c0_i32_0 = arith.constant 0 : i32
    %c0_i32_1 = arith.constant 0 : i32
    return %c0_i32, %c0_i32_0 : i32, i32
  }
  func.func @transform_20(%arg0: i32) -> (i32, i32) {
    %c0_i32 = arith.constant 0 : i32
    %c0_i32_0 = arith.constant 0 : i32
    %c0_i32_1 = arith.constant 0 : i32
    return %c0_i32, %c0_i32_0 : i32, i32
  }
  func.func @transform_21(%arg0: i32) -> (i32, i32, i32) {
    %c0_i32 = arith.constant 0 : i32
    %c0_i32_0 = arith.constant 0 : i32
    %c0_i32_1 = arith.constant 0 : i32
    return %arg0, %c0_i32, %c0_i32_0 : i32, i32, i32
  }
}

</mosaic_0001>

<bundles_post_ra>
// kernel: tpu_custom_call.1
= control target key start
LH: loop header
LB: loop body
LE: loop exit
PB: predicated region body
PF: predicated region fallthrough
CT: control target
= control target key end

     0   :  { %s2814_s0 = inlined_call_operand.vmem [shape: f32[32,128], index: 0, kind: input, shape index: {}]   ;;  %s2815_s1 = inlined_call_operand.vmem [shape: f32[4,16,64], index: 1, kind: input, shape index: {}]   ;;  %s2816_s2 = inlined_call_operand.vmem [shape: f32[4,16,32], index: 2, kind: input, shape index: {}]   ;;  %s2817_s3 = inlined_call_operand.vmem [shape: f32[4,16,32], index: 3, kind: input, shape index: {}]   ;;  %s2818_s4 = inlined_call_operand.vmem [shape: f32[4,128,64], index: 4, kind: input, shape index: {}]   ;;  %s2819_s5 = inlined_call_operand.vmem [shape: f32[4,128,64], index: 5, kind: input, shape index: {}]   ;;  %s2820_s6 = inlined_call_operand.vmem [shape: f32[4,32,16], index: 6, kind: input, shape index: {}]   ;;  %s2821_s7 = inlined_call_operand.vmem [shape: f32[4,32,16], index: 7, kind: input, shape index: {}]   ;;  %s2822_s8 = inlined_call_operand.vmem [shape: f32[4,64,128], index: 8, kind: input, shape index: {}]   ;;  %s2823_s9 = inlined_call_operand.vmem [shape: f32[4,64,128], index: 9, kind: input, shape index: {}]   ;;  %s2824_s10 = inlined_call_operand.vmem [shape: f32[16,16], index: 10, kind: input, shape index: {}]   ;;  %s2825_s11 = inlined_call_operand.vmem [shape: f32[16,16], index: 11, kind: input, shape index: {}]   ;;  %s2826_s12 = inlined_call_operand.vmem [shape: f32[64,64], index: 12, kind: input, shape index: {}]   ;;  %s2827_s13 = inlined_call_operand.vmem [shape: f32[64,64], index: 13, kind: input, shape index: {}]   ;;  %s2828_s14 = inlined_call_operand.vmem [shape: f32[16,16], index: 14, kind: input, shape index: {}]   ;;  %s2829_s15 = inlined_call_operand.vmem [shape: f32[16,16], index: 15, kind: input, shape index: {}]   ;;  %s2830_s16 = inlined_call_operand.vmem [shape: f32[64,64], index: 16, kind: input, shape index: {}]   ;;  %s2831_s17 = inlined_call_operand.vmem [shape: f32[64,64], index: 17, kind: input, shape index: {}]   ;;  %s2832_s18 = inlined_call_operand.vmem [shape: f32[16,64], index: 18, kind: input, shape index: {}]   ;;  %s2833_s19 = inlined_call_operand.vmem [shape: f32[16,64], index: 19, kind: input, shape index: {}]   ;;  %s2834_s20 = inlined_call_operand.vmem [shape: f32[64,64], index: 20, kind: input, shape index: {}]   ;;  %s2835_s21 = inlined_call_operand.hbm [shape: f32[4,32,128], index: 21, kind: output, shape index: {}]  }
   0x1   :  { %2862 = sst [smem:[#allocation69_spill]] %s2814_s0 }
   0x2   :  { %2863 = sst [smem:[#allocation70_spill]] %s2815_s1 }
   0x3   :  { %2864 = sst [smem:[#allocation71_spill]] %s2816_s2 }
   0x4   :  { %2865 = sst [smem:[#allocation72_spill]] %s2817_s3 }
   0x5   :  { %2866 = sst [smem:[#allocation73_spill]] %s2818_s4 }
   0x6   :  { %2867 = sst [smem:[#allocation74_spill]] %s2819_s5 }
   0x7   :  { %2868 = sst [smem:[#allocation75_spill]] %s2826_s12 }
   0x8   :  { %2869 = sst [smem:[#allocation76_spill]] %s2827_s13 }
   0x9   :  { %2870 = sst [smem:[#allocation77_spill]] %s2828_s14 }
   0xa   :  { %2871 = sst [smem:[#allocation78_spill]] %s2829_s15 }
   0xb   :  { %2872 = sst [smem:[#allocation79_spill]] %s2830_s16 }
   0xc   :  { %2873 = sst [smem:[#allocation80_spill]] %s2831_s17 }
   0xd   :  { %2874 = sst [smem:[#allocation81_spill]] %s2832_s18 }
   0xe   :  { %2875 = sst [smem:[#allocation82_spill]] %s2833_s19 }
   0xf   :  { %2876 = sst [smem:[#allocation83_spill]] %s2834_s20 }
  0x10   :  { %2877 = sst [smem:[#allocation84_spill]] %s2835_s21 }
  0x11   :  { %26 = vsyncpa [#allocation5], 0 }
  0x12   :  { %28 = vsyncpa [#allocation5 + $0x1], 0  ;;  %s2028_s2 = smov 0   ;;  %s2030_s25 = smov 0  }
  0x13   :  { %s2032_s26 = smov 0   ;;  %s2034_s27 = smov 0  }
  0x14 LB: > { %2878 = sst [smem:[#allocation9_spill]] %s1902_s2  ;;  %s2049_s3 = sadd.s32 4294967295, %s1914_s27   ;;  %s1914_s27 = sphi %s2034_s27, %s3019_s27   ;;  %s1910_s26 = sphi %s2032_s26, %s3022_s26   ;;  %s1906_s25 = sphi %s2030_s25, %s3021_s25   ;;  %s1902_s2 = sphi %s2028_s2, %s3020_s2  }
  0x15   : > { %2879 = sst [smem:[#allocation10_spill]] %s1906_s25  ;;  %s1723_s28 = sadd.s32 4294967294, %s1914_s27  }
  0x16   : > { %2880 = sst [smem:[#allocation11_spill]] %s1910_s26  ;;  %s2053_s29 = sadd.s32 1, %s1914_s27  }
  0x17   : > { %2881 = sst [smem:[#allocation12_spill]] %s1914_s27  ;;  %s506_s0 = sadd.s32 1, %s1910_s26 }
  0x18   : > { %2882 = sst [smem:[#allocation13_spill]] %s2053_s29  ;;  %s503_s4 = ssub.s32 %s1914_s27, %s2053_s29 }
  0x19   : > { %p516_p0 = scmp.ne.s32.totalorder %s1910_s26, %s1906_s25  ;;  %p504_p1 = scmp.eq.s32.totalorder %s503_s4, 0 }
  0x1a   : > { %p517_p2 = scmp.eq.s32.totalorder %s2049_s3, 3  ;;  %p522_p3 = scmp.ne.s32.totalorder %s1906_s25, %s1902_s2 }
  0x1b   : > { %p523_p4 = scmp.eq.s32.totalorder %s1723_s28, 3  ;;  %p1726_p7 = scmp.ge.s32.totalorder %s1914_s27, 1 }
  0x1c   : > { %s2064_s30 = scalar_select %p504_p1, %s1910_s26, %s506_s0  }
  0x1d   : > { %p2066_p5 = por %p517_p2, %p516_p0  ;;  %p2070_p6 = por %p523_p4, %p522_p3 }
  0x1e   : > { %2883 = sst [smem:[#allocation14_spill]] %s2064_s30  ;;  %p646_p8 = scmp.lt.s32.totalorder %s1914_s27, 5 }
  0x1f   : > { %s2884_s5 = scalar_select %p2066_p5, 1, 0 }
  0x20   : > { %s2886_s22 = scalar_select %p2070_p6, 1, 0 }
  0x21   : > { %2885 = sst [smem:[#allocation15_spill]] %s2884_s5  ;;  %p647_p9 = pnand %p1726_p7, %p646_p8 }
  0x22   : > { %2887 = sst [smem:[#allocation16_spill]] %s2886_s22 }
  0x23   : > { %650 = sbr.rel (%p647_p9) target bundleno = 1640 (0x668), region = 100 }
  0x28   : > { %s2852_s23 = sand.u32 1, %s1906_s25   ;;  %p744_p10 = scmp.lt.s32.totalorder %s2049_s3, 3 }
  0x29   : > { %s1727_s1 = sshll.u32 %s2852_s23, 5  ;;  %s2888_s26 = sld [smem:[#allocation70_spill]] }
  0x2a   : > { %s745_s24 = scalar_select %p744_p10, %s2049_s3, 3 }
  0x2b   : > { %s2889_s27 = sld [smem:[#allocation71_spill]]  ;;  %p1746_p11 = scmp.ne.s32.totalorder %s2049_s3, 0 }
  0x2c   : > { %s1792_s28 = sshll.u32 %s745_s24, 4  ;;  %s1795_s0 = sshll.u32 %s745_s24, 7 }
  0x2d   : > { %s2890_s19 = sld [smem:[#allocation72_spill]]  ;;  %s1799_s20 = sshll.u32 %s745_s24, 6 }
  0x2e   : > { %s2891_s25 = sld [smem:[#allocation73_spill]]  ;;  %s2115_s21 = scalar_lea.vmem %s2822_s8, %s1799_s20 }
  0x2f   : > { %s2084_s29 = scalar_lea.vmem %s2888_s26, %s1792_s28  ;;  %s2892_s13 = sld [smem:[#allocation74_spill]] }
  0x30   : > { %s1797_s26 = sshll.u32 %s745_s24, 5  ;;  %s2120_s15 = scalar_lea.vmem %s2823_s9, %s1799_s20 }
  0x31   : > { %s753_s5 = scalar_lea.vmem %s2889_s27, %s1792_s28  ;;  %s2105_s2 = scalar_lea.vmem %s2820_s6, %s1797_s26 }
  0x32   : > { %792 = sbr.rel (%p1746_p11) target bundleno = 65 (0x41), region = 104 }
  0x33   : > { %s758_s18 = scalar_lea.vmem %s2890_s19, %s1792_s28  ;;  %s2110_s19 = scalar_lea.vmem %s2821_s7, %s1797_s26 }
  0x34   : > { %s2095_s23 = scalar_lea.vmem %s2891_s25, %s1795_s0  ;;  %s2122_s25 = scalar_lea.vmem [#allocation4], %s1727_s1 }
  0x35   : > { %s2100_s12 = scalar_lea.vmem %s2892_s13, %s1795_s0  ;;  %s2893_s26 = sld [smem:[#allocation69_spill]] (!%p1746_p11) }
  0x3b   : > { %s2894_s30 = smov %s2893_s26  ;;  %v803_v0 = vld [vmem:[%s2893_s26] sm:$0xff] }
  0x3c   : > { %v805_v1 = vld [vmem:[%s2894_s30 + $0x8] sm:$0xff]  ;;  %v807_v2 = vld [vmem:[%s2894_s30 + $0x10] sm:$0xff]  ;;  %804 = vst [vmem:[#allocation2 + $0x10] sm:$0xff] %v803_v0  ;;  %v809_v3 = vld [vmem:[%s2894_s30 + $0x18] sm:$0xff] }
  0x3d   : > { %806 = vst [vmem:[#allocation2] sm:$0xff] %v805_v1 }
  0x3e   : > { %808 = vst [vmem:[#allocation2 + $0x18] sm:$0xff] %v807_v2 }
  0x3f   : > { %810 = vst [vmem:[#allocation2 + $0x8] sm:$0xff] %v809_v3 }
  0x40   : > { %816 = vsyncadd [#allocation3], 512 }
  0x41 PF: > { %v2137_v4 = vld [vmem:[%s753_s5] sm:$0xff]  ;;  %v2139_v5 = vld [vmem:[%s753_s5 + $0x8] sm:$0xff]  ;;  %p1812_p12 = scmp.eq.s32.totalorder %s2049_s3, 0  ;;  %v2153_v10 = vld [vmem:[%s2095_s23 + $0x10] sm:$0xff]  ;;  %s2925_s14 = sld [smem:[#allocation75_spill]] }
  0x42   : > { %v2141_v6 = vld [vmem:[%s758_s18] sm:$0xff]  ;;  %v2144_v7 = vld [vmem:[%s758_s18 + $0x8] sm:$0xff]  ;;  %v2156_v11 = vld [vmem:[%s2095_s23 + $0x18] sm:$0xff]  ;;  %s2936_s5 = sld [smem:[#allocation77_spill]] }
  0x43   : > { %v2147_v8 = vld [vmem:[%s2095_s23] sm:$0xff]  ;;  %v2150_v9 = vld [vmem:[%s2095_s23 + $0x8] sm:$0xff]  ;;  %v2165_v14 = vld [vmem:[%s2095_s23 + $0x30] sm:$0xff]  ;;  %s2942_s0 = sld [smem:[#allocation79_spill]] }
  0x44   : > { %v2159_v12 = vld [vmem:[%s2095_s23 + $0x20] sm:$0xff]  ;;  %v2162_v13 = vld [vmem:[%s2095_s23 + $0x28] sm:$0xff]  ;;  %v2168_v15 = vld [vmem:[%s2095_s23 + $0x38] sm:$0xff]  ;;  %s2946_s28 = sld [smem:[#allocation80_spill]] }
  0x45   : > { %v2171_v16 = vld [vmem:[%s2095_s23 + $0x40] sm:$0xff]  ;;  %v2174_v17 = vld [vmem:[%s2095_s23 + $0x48] sm:$0xff]  ;;  %v2177_v18 = vld [vmem:[%s2095_s23 + $0x50] sm:$0xff]  ;;  %s2950_s26 = sld [smem:[#allocation81_spill]] }
  0x46   : > { %v2180_v19 = vld [vmem:[%s2095_s23 + $0x58] sm:$0xff]  ;;  %v2183_v20 = vld [vmem:[%s2095_s23 + $0x60] sm:$0xff]  ;;  %v2186_v21 = vld [vmem:[%s2095_s23 + $0x68] sm:$0xff]  ;;  %s2954_s16 = sld [smem:[#allocation82_spill]] }
  0x47   : > { %v2189_v22 = vld [vmem:[%s2095_s23 + $0x70] sm:$0xff]  ;;  %v2192_v23 = vld [vmem:[%s2095_s23 + $0x78] sm:$0xff]  ;;  %v2195_v24 = vld [vmem:[%s2100_s12] sm:$0xff] }
  0x48   : > { %v2198_v25 = vld [vmem:[%s2100_s12 + $0x8] sm:$0xff]  ;;  %v2201_v26 = vld [vmem:[%s2100_s12 + $0x10] sm:$0xff]  ;;  %v2204_v27 = vld [vmem:[%s2100_s12 + $0x18] sm:$0xff] }
  0x49   : > { %v2207_v28 = vld [vmem:[%s2100_s12 + $0x20] sm:$0xff]  ;;  %v2210_v29 = vld [vmem:[%s2100_s12 + $0x28] sm:$0xff]  ;;  %v2213_v30 = vld [vmem:[%s2100_s12 + $0x30] sm:$0xff] }
  0x4a   : > { %v2216_v31 = vld [vmem:[%s2100_s12 + $0x38] sm:$0xff]  ;;  %v2219_v32 = vld [vmem:[%s2100_s12 + $0x40] sm:$0xff]  ;;  %v2222_v33 = vld [vmem:[%s2100_s12 + $0x48] sm:$0xff] }
  0x4b   : > { %v2225_v34 = vld [vmem:[%s2100_s12 + $0x50] sm:$0xff]  ;;  %v2228_v35 = vld [vmem:[%s2100_s12 + $0x58] sm:$0xff]  ;;  %v2231_v36 = vld [vmem:[%s2100_s12 + $0x60] sm:$0xff]  ;;  %s2951_s24 = smov %s2950_s26 }
  0x4c   : > { %v2234_v37 = vld [vmem:[%s2100_s12 + $0x68] sm:$0xff]  ;;  %v2237_v38 = vld [vmem:[%s2100_s12 + $0x70] sm:$0xff]  ;;  %v2240_v39 = vld [vmem:[%s2100_s12 + $0x78] sm:$0xff] }
  0x4d   : > { %v2243_v40 = vld [vmem:[%s2105_s2] sm:$0xff]  ;;  %v2246_v41 = vld [vmem:[%s2105_s2 + $0x8] sm:$0xff]  ;;  %v2249_v42 = vld [vmem:[%s2105_s2 + $0x10] sm:$0xff] }
  0x4e   : > { %2895 = vst [vmem:[#allocation17_spill] sm:$0xff] %v2243_v40  ;;  %v2252_v43 = vld [vmem:[%s2105_s2 + $0x18] sm:$0xff]  ;;  %v2255_v44 = vld [vmem:[%s2110_s19] sm:$0xff]  ;;  %v2258_v45 = vld [vmem:[%s2110_s19 + $0x8] sm:$0xff]  ;;  %s2926_s2 = sld [smem:[#allocation76_spill]] }
  0x4f   : > { %2896 = vst [vmem:[#allocation18_spill] sm:$0xff] %v2246_v41  ;;  %v2261_v46 = vld [vmem:[%s2110_s19 + $0x10] sm:$0xff]  ;;  %v2264_v47 = vld [vmem:[%s2110_s19 + $0x18] sm:$0xff]  ;;  %v2267_v48 = vld [vmem:[%s2115_s21] sm:$0xff] }
  0x50   : > { %2897 = vst [vmem:[#allocation19_spill] sm:$0xff] %v2249_v42  ;;  %v2270_v49 = vld [vmem:[%s2115_s21 + $0x8] sm:$0xff]  ;;  %v2273_v50 = vld [vmem:[%s2115_s21 + $0x10] sm:$0xff]  ;;  %v2276_v51 = vld [vmem:[%s2115_s21 + $0x18] sm:$0xff] }
  0x51   : > { %2898 = vst [vmem:[#allocation20_spill] sm:$0xff] %v2252_v43  ;;  %v2279_v52 = vld [vmem:[%s2115_s21 + $0x20] sm:$0xff]  ;;  %v2282_v53 = vld [vmem:[%s2115_s21 + $0x28] sm:$0xff]  ;;  %v2285_v54 = vld [vmem:[%s2115_s21 + $0x30] sm:$0xff] }
  0x52   : > { %2899 = vst [vmem:[#allocation21_spill] sm:$0xff] %v2255_v44  ;;  %v2288_v55 = vld [vmem:[%s2115_s21 + $0x38] sm:$0xff]  ;;  %v2291_v56 = vld [vmem:[%s2120_s15] sm:$0xff]  ;;  %v2294_v57 = vld [vmem:[%s2120_s15 + $0x8] sm:$0xff] }
  0x53   : > { %2900 = vst [vmem:[#allocation22_spill] sm:$0xff] %v2258_v45  ;;  %v2297_v58 = vld [vmem:[%s2120_s15 + $0x10] sm:$0xff]  ;;  %v2300_v59 = vld [vmem:[%s2120_s15 + $0x18] sm:$0xff]  ;;  %v2303_v60 = vld [vmem:[%s2120_s15 + $0x20] sm:$0xff] }
  0x54   : > { %2901 = vst [vmem:[#allocation23_spill] sm:$0xff] %v2261_v46  ;;  %v2306_v61 = vld [vmem:[%s2120_s15 + $0x28] sm:$0xff]  ;;  %v2309_v62 = vld [vmem:[%s2120_s15 + $0x30] sm:$0xff]  ;;  %v2312_v63 = vld [vmem:[%s2120_s15 + $0x38] sm:$0xff]  ;;  %s2927_s19 = smov %s2926_s2 }
  0x55   : > { %2902 = vst [vmem:[#allocation24_spill] sm:$0xff] %v2264_v47  ;;  %v2315_v0 = vld [vmem:[%s2084_s29] sm:$0xff]  ;;  %v2318_v1 = vld [vmem:[%s2084_s29 + $0x8] sm:$0xff]  ;;  %v2353_v41 = vld [vmem:[%s2925_s14 + $0x10] sm:$0xff]  ;;  %s2939_s29 = sld [smem:[#allocation78_spill]] }
  0x56   : > { %2903 = vst [vmem:[#allocation25_spill] sm:$0xff] %v2267_v48  ;;  %v2323_v2 = vld [vmem:[%s2824_s10] sm:$0xff]  ;;  %v2328_v3 = vld [vmem:[%s2824_s10 + $0x8] sm:$0xff]  ;;  %v2358_v45 = vld [vmem:[%s2925_s14 + $0x18] sm:$0xff] }
  0x57   : > { %2904 = vst [vmem:[#allocation26_spill] sm:$0xff] %v2270_v49  ;;  %v2333_v43 = vld [vmem:[%s2825_s11] sm:$0xff]  ;;  %v2338_v47 = vld [vmem:[%s2825_s11 + $0x8] sm:$0xff]  ;;  %v2373_v48 = vld [vmem:[%s2925_s14 + $0x30] sm:$0xff] }
  0x58   : > { %2905 = vst [vmem:[#allocation27_spill] sm:$0xff] %v2273_v50  ;;  %v2343_v42 = vld [vmem:[%s2925_s14] sm:$0xff]  ;;  %v2348_v46 = vld [vmem:[%s2925_s14 + $0x8] sm:$0xff]  ;;  %v2378_v49 = vld [vmem:[%s2925_s14 + $0x38] sm:$0xff] }
  0x59   : > { %2906 = vst [vmem:[#allocation28_spill] sm:$0xff] %v2276_v51  ;;  %v2363_v44 = vld [vmem:[%s2925_s14 + $0x20] sm:$0xff]  ;;  %v2368_v40 = vld [vmem:[%s2925_s14 + $0x28] sm:$0xff] }
  0x5a   : > { %2907 = vst [vmem:[#allocation29_spill] sm:$0xff] %v2279_v52  ;;  %v2383_v50 = vld [vmem:[%s2926_s2] sm:$0xff]  ;;  %v2388_v51 = vld [vmem:[%s2927_s19 + $0x8] sm:$0xff]  ;;  %v2393_v52 = vld [vmem:[%s2927_s19 + $0x10] sm:$0xff]  ;;  %s2957_s2 = sld [smem:[#allocation83_spill]] }
  0x5b   : > { %2908 = vst [vmem:[#allocation30_spill] sm:$0xff] %v2282_v53  ;;  %v2398_v53 = vld [vmem:[%s2927_s19 + $0x18] sm:$0xff] }
  0x5c   : > { %2909 = vst [vmem:[#allocation31_spill] sm:$0xff] %v2285_v54  ;;  %v2403_v54 = vld [vmem:[%s2927_s19 + $0x20] sm:$0xff] }
  0x5d   : > { %2910 = vst [vmem:[#allocation32_spill] sm:$0xff] %v2288_v55  ;;  %v2408_v55 = vld [vmem:[%s2927_s19 + $0x28] sm:$0xff] }
  0x5e   : > { %2911 = vst [vmem:[#allocation33_spill] sm:$0xff] %v2291_v56  ;;  %v2423_v56 = vld [vmem:[%s2936_s5] sm:$0xff] }
  0x5f   : > { %2912 = vst [vmem:[#allocation34_spill] sm:$0xff] %v2294_v57  ;;  %v2428_v57 = vld [vmem:[%s2936_s5 + $0x8] sm:$0xff] }
  0x60   : > { %2913 = vst [vmem:[#allocation35_spill] sm:$0xff] %v2297_v58  ;;  %v2433_v58 = vld [vmem:[%s2939_s29] sm:$0xff]  ;;  %s2958_s17 = smov %s2957_s2 }
  0x61   : > { %2914 = vst [vmem:[#allocation36_spill] sm:$0xff] %v2300_v59  ;;  %v2438_v59 = vld [vmem:[%s2939_s29 + $0x8] sm:$0xff] }
  0x62   : > { %2915 = vst [vmem:[#allocation37_spill] sm:$0xff] %v2303_v60  ;;  %v2443_v60 = vld [vmem:[%s2942_s0] sm:$0xff] }
  0x63   : > { %2916 = vst [vmem:[#allocation38_spill] sm:$0xff] %v2306_v61  ;;  %v2468_v61 = vld [vmem:[%s2942_s0 + $0x28] sm:$0xff] }
  0x64   : > { %2917 = vst [vmem:[#allocation39_spill] sm:$0xff] %v2309_v62  ;;  %v2473_v62 = vld [vmem:[%s2942_s0 + $0x30] sm:$0xff] }
  0x65   : > { %2918 = vst [vmem:[#allocation40_spill] sm:$0xff] %v2312_v63  ;;  %v2478_v63 = vld [vmem:[%s2942_s0 + $0x38] sm:$0xff] }
  0x66   : > { %2919 = vst [vmem:[#allocation41_spill] sm:$0xff] %v2315_v0  ;;  %v2418_v0 = vld [vmem:[%s2927_s19 + $0x38] sm:$0xff] }
  0x67   : > { %2920 = vst [vmem:[#allocation42_spill] sm:$0xff] %v2318_v1  ;;  %v2413_v1 = vld [vmem:[%s2927_s19 + $0x30] sm:$0xff] }
  0x68   : > { %2921 = vst [vmem:[#allocation43_spill] sm:$0xff] %v2323_v2  ;;  %v2538_v2 = vld [vmem:[%s2954_s16 + $0x8] sm:$0xff] }
  0x69   : > { %2922 = vst [vmem:[#allocation44_spill] sm:$0xff] %v2328_v3  ;;  %v2508_v3 = vld [vmem:[%s2946_s28 + $0x28] sm:$0xff] }
  0x6a   : > { %2923 = vst [vmem:[#allocation45_spill] sm:$0xff] %v2333_v43  ;;  %v2533_v43 = vld [vmem:[%s2954_s16] sm:$0xff] }
  0x6b   : > { %2924 = vst [vmem:[#allocation46_spill] sm:$0xff] %v2338_v47  ;;  %v2503_v47 = vld [vmem:[%s2946_s28 + $0x20] sm:$0xff] }
  0x6c   : > { %2928 = vst [vmem:[#allocation47_spill] sm:$0xff] %v2383_v50  ;;  %v2483_v50 = vld [vmem:[%s2946_s28] sm:$0xff] }
  0x6d   : > { %2929 = vst [vmem:[#allocation48_spill] sm:$0xff] %v2388_v51  ;;  %v2488_v51 = vld [vmem:[%s2946_s28 + $0x8] sm:$0xff] }
  0x6e   : > { %2930 = vst [vmem:[#allocation49_spill] sm:$0xff] %v2393_v52  ;;  %v2493_v52 = vld [vmem:[%s2946_s28 + $0x10] sm:$0xff] }
  0x6f   : > { %2931 = vst [vmem:[#allocation50_spill] sm:$0xff] %v2398_v53  ;;  %v2498_v53 = vld [vmem:[%s2946_s28 + $0x18] sm:$0xff] }
  0x70   : > { %2932 = vst [vmem:[#allocation51_spill] sm:$0xff] %v2403_v54  ;;  %v2513_v54 = vld [vmem:[%s2946_s28 + $0x30] sm:$0xff] }
  0x71   : > { %2933 = vst [vmem:[#allocation52_spill] sm:$0xff] %v2408_v55  ;;  %v2518_v55 = vld [vmem:[%s2946_s28 + $0x38] sm:$0xff] }
  0x72   : > { %2934 = vst [vmem:[#allocation53_spill] sm:$0xff] %v2413_v1  ;;  %v2523_v1 = vld [vmem:[%s2950_s26] sm:$0xff] }
  0x73   : > { %2935 = vst [vmem:[#allocation54_spill] sm:$0xff] %v2418_v0  ;;  %v2528_v0 = vld [vmem:[%s2951_s24 + $0x8] sm:$0xff] }
  0x74   : > { %2937 = vst [vmem:[#allocation55_spill] sm:$0xff] %v2423_v56  ;;  %v2448_v56 = vld [vmem:[%s2942_s0 + $0x8] sm:$0xff] }
  0x75   : > { %2938 = vst [vmem:[#allocation56_spill] sm:$0xff] %v2428_v57  ;;  %v2453_v57 = vld [vmem:[%s2942_s0 + $0x10] sm:$0xff] }
  0x76   : > { %2940 = vst [vmem:[#allocation57_spill] sm:$0xff] %v2433_v58  ;;  %v2458_v58 = vld [vmem:[%s2942_s0 + $0x18] sm:$0xff] }
  0x77   : > { %2941 = vst [vmem:[#allocation58_spill] sm:$0xff] %v2438_v59  ;;  %v2463_v59 = vld [vmem:[%s2942_s0 + $0x20] sm:$0xff] }
  0x78   : > { %2943 = vst [vmem:[#allocation59_spill] sm:$0xff] %v2443_v60  ;;  %v2543_v60 = vld [vmem:[%s2957_s2] sm:$0xff] }
  0x79   : > { %2944 = vst [vmem:[#allocation60_spill] sm:$0xff] %v2448_v56  ;;  %v2573_v56 = vld [vmem:[%s2958_s17 + $0x30] sm:$0xff] }
  0x7a   : > { %2945 = vst [vmem:[#allocation61_spill] sm:$0xff] %v2453_v57 }
  0x7b   : > { %2947 = vst [vmem:[#allocation62_spill] sm:$0xff] %v2483_v50  ;;  %v2568_v50 = vld [vmem:[%s2958_s17 + $0x28] sm:$0xff] }
  0x7c   : > { %2948 = vst [vmem:[#allocation63_spill] sm:$0xff] %v2488_v51  ;;  %v2578_v51 = vld [vmem:[%s2958_s17 + $0x38] sm:$0xff] }
  0x7d   : > { %2949 = vst [vmem:[#allocation64_spill] sm:$0xff] %v2493_v52 }
  0x7e   : > { %2952 = vst [vmem:[#allocation65_spill] sm:$0xff] %v2523_v1  ;;  %v2548_v1 = vld [vmem:[%s2958_s17 + $0x8] sm:$0xff] }
  0x7f   : > { %2953 = vst [vmem:[#allocation66_spill] sm:$0xff] %v2528_v0  ;;  %v2553_v0 = vld [vmem:[%s2958_s17 + $0x10] sm:$0xff] }
  0x80   : > { %2955 = vst [vmem:[#allocation67_spill] sm:$0xff] %v2533_v43  ;;  %v2558_v43 = vld [vmem:[%s2958_s17 + $0x18] sm:$0xff] }
  0x81   : > { %2956 = vst [vmem:[#allocation68_spill] sm:$0xff] %v2538_v2  ;;  %v2563_v2 = vld [vmem:[%s2958_s17 + $0x20] sm:$0xff] }
  0x82   : > { %1893 = dma.done.wait (%p1812_p12), [#allocation3], 512 }
  0x83   : > { %1895 = vsyncadd (%p1812_p12), [#allocation3], 4294966784  ;;  %1000 = vmatpush.msra.mxu2 %v2240_v39  ;;  %1023 = vmatpush.msra.mxu3 %v2192_v23  ;;  %v2592_v57 = vld [vmem:[#allocation2 + $0x8] sm:$0xff]  ;;  %v2594_v52 = vld [vmem:[#allocation2 + $0x18] sm:$0xff]  ;;  %vm941_vm0 = vcmask 261120   ;;  %vm1048_vm1 = vcmask 523264  }
  0x84   : > { %960 = vmatpush.msra.mxu0 %v2592_v57  ;;  %989 = vmatpush.msra.mxu1 %v2592_v57  ;;  %v2598_v23 = vld [vmem:[#allocation2] sm:$0xff]  ;;  %vm1082_vm2 = vcmask 130048   ;;  %v2974_v39 = vld [vmem:[#allocation51_spill] sm:$0xff]  ;;  %s1801_s13 = sshll.u32 %s2049_s3, 5  ;;  %s3011_s15 = sld [smem:[#allocation10_spill]] }
  0x85   : > { %1001 = vmatpush.msra.mxu2 %v2237_v38  ;;  %1024 = vmatpush.msra.mxu3 %v2189_v22  ;;  %v2973_v38 = vld [vmem:[#allocation52_spill] sm:$0xff]  ;;  %s3012_s27 = sld [smem:[#allocation84_spill]]  ;;  %s1552_s18 = sshll.u32 %s2122_s25, 4  ;;  %s1553_s18 = int_to_ptr.vmem [resolvable:$true] %s1552_s18 }
  0x86   : > { %961 = vmatpush.msra.mxu0 %v2594_v52  ;;  %990 = vmatpush.msra.mxu1 %v2594_v52 }
  0x87   : > { %1002 = vmatpush.msra.mxu2 %v2234_v37  ;;  %1025 = vmatpush.msra.mxu3 %v2186_v21  ;;  %v2604_v21 = vld [vmem:[#allocation2 + $0x10] sm:$0xff]  ;;  %v2972_v37 = vld [vmem:[#allocation53_spill] sm:$0xff] }
  0x88   : > { %962 = vmatpush.msra.mxu0 %v2598_v23  ;;  %991 = vmatpush.msra.mxu1 %v2598_v23 }
  0x89   : > { %1003 = vmatpush.msra.mxu2 %v2231_v36  ;;  %1026 = vmatpush.msra.mxu3 %v2183_v20  ;;  %v2971_v36 = vld [vmem:[#allocation54_spill] sm:$0xff] }
  0x8a   : > { %963 = vmatpush.msra.mxu0 %v2604_v21  ;;  %992 = vmatpush.msra.mxu1 %v2604_v21  ;;  %s3015_s3 = sand.u32 1, %s3011_s15  }
  0x8b   : > { %1004 = vmatpush.msra.mxu2 %v2228_v35  ;;  %1027 = vmatpush.msra.mxu3 %v2180_v19  ;;  %v2970_v35 = vld [vmem:[#allocation45_spill] sm:$0xff]  ;;  %s3013_s22 = smov %s3012_s27  ;;  %s1551_s20 = scalar_lea.hbm %s3012_s27, %s1801_s13 }
  0x8c   : > { %1748 = vmatmul.msk.f32.vlgmr.msra.gmra.mxu0 %vm941_vm0, %v2137_v4  ;;  %1750 = vmatmul.msk.f32.vlgmr.msra.gmra.mxu1 %vm941_vm0, %v2141_v6  ;;  %s1554_s23 = sshll.u32 %s1551_s20, 4  ;;  %s1540_s1 = scalar_lea.sflag [#allocation5], %s3015_s3  ;;  %s1555_s23 = int_to_ptr.hbm [resolvable:$true] %s1554_s23 }
  0x8d   : > { %1005 = vmatpush.msra.mxu2 %v2225_v34  ;;  %1028 = vmatpush.msra.mxu3 %v2177_v18  ;;  %v2969_v34 = vld [vmem:[#allocation43_spill] sm:$0xff]  ;;  %s1862_s2 = sshra.s32 %s1555_s23, 4  ;;  %s1868_s4 = scalar_lea.hbm %s3013_s22, 128  ;;  %s1863_s2 = int_to_ptr.hbm [resolvable:$true] %s1862_s2 }
  0x8e   : > { %1063 = vmatpush.msrb.mxu1 %v2578_v51  ;;  %s1864_s21 = scalar_lea.hbm %s1863_s2, 32  ;;  %p1869_p2 = scmp.lt.s32.totalorder %s1863_s2, %s3013_s22 }
  0x8f   : > { %1006 = vmatpush.msra.mxu2 %v2222_v33  ;;  %1029 = vmatpush.msra.mxu3 %v2174_v17  ;;  %p1865_p13 = scmp.ne.s32.totalorder %s1863_s2, %s1864_s21  ;;  %p1870_p3 = scmp.lt.s32.totalorder %s1868_s4, %s1864_s21 }
  0x90   : > { %1064 = vmatpush.msrb.mxu1 %v2573_v56 }
  0x91   : > { %1007 = vmatpush.msra.mxu2 %v2219_v32  ;;  %1030 = vmatpush.msra.mxu3 %v2171_v16  ;;  %p1866_p0 = pnand %p1865_p13, %p2066_p5  ;;  %p1871_p4 = por %p1870_p3, %p1869_p2 }
  0x92   : > { %1065 = vmatpush.msrb.mxu1 %v2568_v50 }
  0x93   : > { %1008 = vmatpush.msra.mxu2 %v2216_v31  ;;  %1031 = vmatpush.msra.mxu3 %v2168_v15  ;;  %p1867_p1 = pneg %p1866_p0 }
  0x94   : > { %1749 = vmatmul.msk.f32.gmra.mxu0 %vm941_vm0, %v2139_v5  ;;  %1751 = vmatmul.msk.f32.gmra.mxu1 %vm941_vm0, %v2144_v7 }
  0x95   : > { %1009 = vmatpush.msra.mxu2 %v2213_v30  ;;  %1032 = vmatpush.msra.mxu3 %v2165_v14  ;;  %v2968_v30 = vld [vmem:[#allocation65_spill] sm:$0xff]  ;;  %p1872_p7 = pnand %p1871_p4, %p1867_p1 }
  0x96   : > { %1066 = vmatpush.msrb.mxu1 %v2563_v2 }
  0x97   : > { %1010 = vmatpush.msra.mxu2 %v2210_v29  ;;  %1033 = vmatpush.msra.mxu3 %v2162_v13  ;;  %v2964_v13 = vld [vmem:[#allocation59_spill] sm:$0xff] }
  0x98   : > { %1067 = vmatpush.msrb.mxu1 %v2558_v43 }
  0x99   : > { %1011 = vmatpush.msra.mxu2 %v2207_v28  ;;  %1034 = vmatpush.msra.mxu3 %v2159_v12  ;;  %v2963_v12 = vld [vmem:[#allocation62_spill] sm:$0xff]  ;;  %v2967_v28 = vld [vmem:[#allocation68_spill] sm:$0xff] }
  0x9a   : > { %1068 = vmatpush.msrb.mxu1 %v2553_v0 }
  0x9b   : > { %1012 = vmatpush.msra.mxu2 %v2204_v27  ;;  %1035 = vmatpush.msra.mxu3 %v2156_v11  ;;  %v2962_v11 = vld [vmem:[#allocation60_spill] sm:$0xff] }
  0x9c   : > { %1069 = vmatpush.msrb.mxu1 %v2548_v1 }
  0x9d   : > { %1013 = vmatpush.msra.mxu2 %v2201_v26  ;;  %1036 = vmatpush.msra.mxu3 %v2153_v10  ;;  %v2961_v10 = vld [vmem:[#allocation63_spill] sm:$0xff] }
  0x9e   : > { %1070 = vmatpush.msrb.mxu1 %v2543_v60  ;;  %v2966_v26 = vld [vmem:[#allocation67_spill] sm:$0xff] }
  0x9f   : > { %1014 = vmatpush.msra.mxu2 %v2198_v25  ;;  %1037 = vmatpush.msra.mxu3 %v2150_v9  ;;  %v2960_v9 = vld [vmem:[#allocation61_spill] sm:$0xff] }
  0xa1   : > { %1015 = vmatpush.msra.mxu2 %v2195_v24  ;;  %1038 = vmatpush.msra.mxu3 %v2147_v8  ;;  %v2959_v8 = vld [vmem:[#allocation64_spill] sm:$0xff]  ;;  %v2965_v24 = vld [vmem:[#allocation66_spill] sm:$0xff] }
  0xa3   : > { %1184 = vmatpush.msrb.mxu2 %v2378_v49  ;;  %1213 = vmatpush.msrb.mxu3 %v2578_v51  ;;  %v2981_v49 = vld [vmem:[#allocation40_spill] sm:$0xff] }
  0xa5   : > { %1185 = vmatpush.msrb.mxu2 %v2373_v48  ;;  %1214 = vmatpush.msrb.mxu3 %v2573_v56 }
  0xa7   : > { %1186 = vmatpush.msrb.mxu2 %v2368_v40  ;;  %1215 = vmatpush.msrb.mxu3 %v2568_v50  ;;  %v2975_v40 = vld [vmem:[#allocation44_spill] sm:$0xff] }
  0xa9   : > { %1187 = vmatpush.msrb.mxu2 %v2363_v44  ;;  %1216 = vmatpush.msrb.mxu3 %v2563_v2  ;;  %v2978_v44 = vld [vmem:[#allocation49_spill] sm:$0xff] }
  0xab   : > { %1188 = vmatpush.msrb.mxu2 %v2358_v45  ;;  %1217 = vmatpush.msrb.mxu3 %v2558_v43  ;;  %v2979_v45 = vld [vmem:[#allocation48_spill] sm:$0xff] }
  0xad   : > { %1189 = vmatpush.msrb.mxu2 %v2353_v41  ;;  %1218 = vmatpush.msrb.mxu3 %v2553_v0  ;;  %v2976_v41 = vld [vmem:[#allocation46_spill] sm:$0xff] }
  0xaf   : > { %1190 = vmatpush.msrb.mxu2 %v2348_v46  ;;  %1219 = vmatpush.msrb.mxu3 %v2548_v1  ;;  %v2980_v46 = vld [vmem:[#allocation47_spill] sm:$0xff] }
  0xb1   : > { %1191 = vmatpush.msrb.mxu2 %v2343_v42  ;;  %1220 = vmatpush.msrb.mxu3 %v2543_v60  ;;  %v2977_v42 = vld [vmem:[#allocation50_spill] sm:$0xff] }
 0x109   : > { %v965_v4 = vpop.f32.mrf.mxu0  ;;  %v994_v5 = vpop.f32.mrf.mxu1 }
 0x10a   : > { %1016 = vmatmul.f32.vlgmr.msra.gmra.mxu2 %v994_v5  ;;  %1039 = vmatmul.f32.vlgmr.msra.gmra.mxu3 %v965_v4 }
 0x10b   : > { %1310 = vmatpush.msra.mxu2 %v2518_v55  ;;  %1339 = vmatpush.msra.mxu3 %v2478_v63  ;;  %v2987_v63 = vld [vmem:[#allocation34_spill] sm:$0xff] }
 0x10d   : > { %1311 = vmatpush.msra.mxu2 %v2513_v54  ;;  %1340 = vmatpush.msra.mxu3 %v2473_v62  ;;  %v2983_v54 = vld [vmem:[#allocation38_spill] sm:$0xff]  ;;  %v2986_v62 = vld [vmem:[#allocation35_spill] sm:$0xff] }
 0x10f   : > { %1312 = vmatpush.msra.mxu2 %v2508_v3  ;;  %1341 = vmatpush.msra.mxu3 %v2468_v61  ;;  %v2985_v61 = vld [vmem:[#allocation36_spill] sm:$0xff]  ;;  %v2988_v3 = vld [vmem:[#allocation33_spill] sm:$0xff] }
 0x111   : > { %v968_v6 = vpop.f32.mrf.mxu0  ;;  %v997_v7 = vpop.f32.mrf.mxu1  ;;  %1313 = vmatpush.msra.mxu2 %v2503_v47  ;;  %1342 = vmatpush.msra.mxu3 %v2463_v59  ;;  %v2984_v59 = vld [vmem:[#allocation37_spill] sm:$0xff] }
 0x112   : > { %1019 = vmatmul.f32.gmra.mxu2 %v997_v7  ;;  %1042 = vmatmul.f32.gmra.mxu3 %v968_v6 }
 0x113   : > { %1314 = vmatpush.msra.mxu2 %v2498_v53  ;;  %1343 = vmatpush.msra.mxu3 %v2458_v58  ;;  %v2982_v53 = vld [vmem:[#allocation39_spill] sm:$0xff] }
 0x115   : > { %1315 = vmatpush.msra.mxu2 %v2959_v8  ;;  %1344 = vmatpush.msra.mxu3 %v2960_v9 }
 0x117   : > { %1316 = vmatpush.msra.mxu2 %v2961_v10  ;;  %1345 = vmatpush.msra.mxu3 %v2962_v11 }
 0x119   : > { %1317 = vmatpush.msra.mxu2 %v2963_v12  ;;  %1346 = vmatpush.msra.mxu3 %v2964_v13 }
 0x18d   : > { %v1017_v14 = vpop.f32.mrf.mxu2  ;;  %v1040_v15 = vpop.f32.mrf.mxu3 }
 0x18e   : > { %v1041_v16 = vadd.f32 %v1040_v15, %v1017_v14 }
 0x190   : > { %1752 = vmatmul.msk.f32.vlgmr.msrb.gmra.mxu1 %vm1048_vm1, %v1041_v16  ;;  %v1046_v31 = vmul.f32 %v1041_v16, %v2968_v30 }
 0x195   : > { %v1020_v17 = vpop.f32.mrf.mxu2  ;;  %v1043_v18 = vpop.f32.mrf.mxu3 }
 0x196   : > { %v1044_v19 = vadd.f32 %v1043_v18, %v1020_v17  ;;  %v2989_v18 = vld [vmem:[#allocation41_spill] sm:$0xff] }
 0x198   : > { %1753 = vmatmul.msk.f32.gmra.mxu1 %vm1048_vm1, %v1044_v19  ;;  %v1047_v25 = vmul.f32 %v1044_v19, %v2965_v24 }
 0x20d   : > { %v1072_v20 = vpop.f32.mrf.mxu1 }
 0x20e   : > { %v1078_v27 = vmul.f32 %v1072_v20, %v2966_v26  ;;  %v2990_v20 = vld [vmem:[#allocation42_spill] sm:$0xff] }
 0x210   : > { %v1080_v33 = vadd.f32 %v1078_v27, %v1046_v31  ;;  %v2992_v31 = vld [vmem:[#allocation57_spill] sm:$0xff] }
 0x215   : > { %v1075_v22 = vpop.f32.mrf.mxu1 }
 0x216   : > { %v1079_v29 = vmul.f32 %v1075_v22, %v2967_v28 }
 0x218   : > { %v1081_v32 = vadd.f32 %v1079_v29, %v1047_v25  ;;  %v2991_v29 = vld [vmem:[#allocation55_spill] sm:$0xff] }
 0x21a   : > { %1103 = vmatpush.msra.mxu1 %v1081_v32  ;;  %1132 = vmatpush.msrb.mxu0 %v1081_v32  ;;  %v2993_v32 = vld [vmem:[#allocation32_spill] sm:$0xff] }
 0x21c   : > { %1104 = vmatpush.msra.mxu1 %v1080_v33  ;;  %1133 = vmatpush.msrb.mxu0 %v1080_v33  ;;  %v2994_v33 = vld [vmem:[#allocation31_spill] sm:$0xff] }
 0x21d   : > { %1754 = vmatmul.msk.f32.vlgmr.msra.gmra.mxu1 %vm1082_vm2, %v2969_v34  ;;  %1756 = vmatmul.msk.f32.vlgmr.msrb.gmra.mxu0 %vm1082_vm2, %v2970_v35  ;;  %v2995_v34 = vld [vmem:[#allocation30_spill] sm:$0xff]  ;;  %v2996_v35 = vld [vmem:[#allocation29_spill] sm:$0xff] }
 0x21e   : > { %1155 = vmatpush.msrb.mxu1 %v2971_v36  ;;  %v2997_v36 = vld [vmem:[#allocation56_spill] sm:$0xff] }
 0x220   : > { %1156 = vmatpush.msrb.mxu1 %v2972_v37  ;;  %v2998_v37 = vld [vmem:[#allocation58_spill] sm:$0xff] }
 0x222   : > { %1157 = vmatpush.msrb.mxu1 %v2973_v38 }
 0x224   : > { %1158 = vmatpush.msrb.mxu1 %v2974_v39 }
 0x225   : > { %1755 = vmatmul.msk.f32.gmra.mxu1 %vm1082_vm2, %v2975_v40  ;;  %1757 = vmatmul.msk.f32.gmra.mxu0 %vm1082_vm2, %v2976_v41 }
 0x226   : > { %1159 = vmatpush.msrb.mxu1 %v2977_v42 }
 0x228   : > { %1160 = vmatpush.msrb.mxu1 %v2978_v44 }
 0x22a   : > { %1161 = vmatpush.msrb.mxu1 %v2979_v45 }
 0x22c   : > { %1162 = vmatpush.msrb.mxu1 %v2980_v46 }
 0x29a   : > { %v1106_v47 = vpop.f32.mrf.mxu1  ;;  %v1135_v48 = vpop.f32.mrf.mxu0 }
 0x29b   : > { %1760 = vmatmul.msk.f32.vlgmr.msrb.gmra.mxu2 %vm1048_vm1, %v1106_v47  ;;  %1758 = vmatmul.msk.f32.vlgmr.msrb.gmra.mxu1 %vm1048_vm1, %v1135_v48 }
 0x29c   : > { %1426 = vmatpush.msrb.mxu2 %v2981_v49 }
 0x29e   : > { %1427 = vmatpush.msrb.mxu2 %v2982_v53 }
 0x2a0   : > { %1428 = vmatpush.msrb.mxu2 %v2983_v54 }
 0x2a2   : > { %v1109_v55 = vpop.f32.mrf.mxu1  ;;  %v1138_v58 = vpop.f32.mrf.mxu0  ;;  %1429 = vmatpush.msrb.mxu2 %v2984_v59 }
 0x2a3   : > { %1761 = vmatmul.msk.f32.gmra.mxu2 %vm1048_vm1, %v1109_v55  ;;  %1759 = vmatmul.msk.f32.gmra.mxu1 %vm1048_vm1, %v1138_v58 }
 0x2a4   : > { %1430 = vmatpush.msrb.mxu2 %v2985_v61 }
 0x2a6   : > { %1431 = vmatpush.msrb.mxu2 %v2986_v62  ;;  %v3006_v62 = vld [vmem:[#allocation18_spill] sm:$0xff] }
 0x2a8   : > { %1432 = vmatpush.msrb.mxu2 %v2987_v63  ;;  %v3007_v63 = vld [vmem:[#allocation23_spill] sm:$0xff] }
 0x2aa   : > { %1433 = vmatpush.msrb.mxu2 %v2988_v3  ;;  %v3008_v3 = vld [vmem:[#allocation19_spill] sm:$0xff] }
 0x318   : > { %v1164_v4 = vpop.f32.mrf.mxu1 }
 0x31e   : > { %v1193_v5 = vpop.f32.mrf.mxu2 }
 0x31f   : > { %v1194_v6 = vadd.f32 %v1193_v5, %v1164_v4  ;;  %v3009_v4 = vld [vmem:[#allocation24_spill] sm:$0xff] }
 0x320   : > { %v1167_v7 = vpop.f32.mrf.mxu1  ;;  %v3010_v5 = vld [vmem:[#allocation20_spill] sm:$0xff] }
 0x321   : > { %1762 = vmatmul.msk.f32.vlgmr.msrb.gmra.mxu3 %vm1048_vm1, %v1194_v6  ;;  %v1228_v12 = vmul.f32 %v1194_v6, %v1194_v6 }
 0x326   : > { %v1196_v8 = vpop.f32.mrf.mxu2 }
 0x327   : > { %v1197_v9 = vadd.f32 %v1196_v8, %v1167_v7 }
 0x329   : > { %1763 = vmatmul.msk.f32.gmra.mxu3 %vm1048_vm1, %v1197_v9  ;;  %v1229_v15 = vmul.f32 %v1197_v9, %v1197_v9 }
 0x3a4   : > { %v1222_v10 = vpop.f32.mrf.mxu3 }
 0x3a5   : > { %v1230_v11 = vmul.f32 %v1222_v10, %v1222_v10 }
 0x3a7   : > { %v1232_v14 = vadd.f32 %v1230_v11, %v1228_v12 }
 0x3a9   : > { %v1234_v19 = vsub.f32 %v1232_v14, %v2989_v18 }
 0x3ab   : > { %v1236_v27 = vmul.f32 %v1234_v19, %v1194_v6 }
 0x3ac   : > { %v1225_v13 = vpop.f32.mrf.mxu3 }
 0x3ad   : > { %v1231_v16 = vmul.f32 %v1225_v13, %v1225_v13 }
 0x3af   : > { %v1233_v17 = vadd.f32 %v1231_v16, %v1229_v15 }
 0x3b1   : > { %v1235_v22 = vsub.f32 %v1233_v17, %v2990_v20 }
 0x3b3   : > { %v1237_v25 = vmul.f32 %v1235_v22, %v1197_v9 }
 0x3b5   : > { %1258 = vmatpush.msra.mxu0 %v1237_v25  ;;  %1287 = vmatpush.msra.mxu1 %v1237_v25 }
 0x3b7   : > { %1259 = vmatpush.msra.mxu0 %v1236_v27  ;;  %1288 = vmatpush.msra.mxu1 %v1236_v27 }
 0x3b8   : > { %1764 = vmatmul.msk.f32.vlgmr.msra.gmra.mxu0 %vm1082_vm2, %v2991_v29  ;;  %1766 = vmatmul.msk.f32.vlgmr.msra.gmra.mxu1 %vm1082_vm2, %v2992_v31 }
 0x3b9   : > { %1370 = vmatpush.msrb.mxu0 %v2578_v51  ;;  %1403 = vmatpush.msrb.mxu1 %v2993_v32  ;;  %v2999_v51 = vld [vmem:[#allocation28_spill] sm:$0xff] }
 0x3bb   : > { %1371 = vmatpush.msrb.mxu0 %v2573_v56  ;;  %1404 = vmatpush.msrb.mxu1 %v2994_v33  ;;  %v3000_v56 = vld [vmem:[#allocation27_spill] sm:$0xff] }
 0x3bd   : > { %1372 = vmatpush.msrb.mxu0 %v2568_v50  ;;  %1405 = vmatpush.msrb.mxu1 %v2995_v34  ;;  %v3001_v50 = vld [vmem:[#allocation26_spill] sm:$0xff] }
 0x3bf   : > { %1373 = vmatpush.msrb.mxu0 %v2563_v2  ;;  %1406 = vmatpush.msrb.mxu1 %v2996_v35  ;;  %v3002_v2 = vld [vmem:[#allocation25_spill] sm:$0xff] }
 0x3c0   : > { %1765 = vmatmul.msk.f32.gmra.mxu0 %vm1082_vm2, %v2997_v36  ;;  %1767 = vmatmul.msk.f32.gmra.mxu1 %vm1082_vm2, %v2998_v37 }
 0x3c1   : > { %1374 = vmatpush.msrb.mxu0 %v2558_v43  ;;  %1407 = vmatpush.msrb.mxu1 %v2999_v51 }
 0x3c3   : > { %1375 = vmatpush.msrb.mxu0 %v2553_v0  ;;  %1408 = vmatpush.msrb.mxu1 %v3000_v56 }
 0x3c5   : > { %1376 = vmatpush.msrb.mxu0 %v2548_v1  ;;  %1409 = vmatpush.msrb.mxu1 %v3001_v50 }
 0x3c7   : > { %1377 = vmatpush.msrb.mxu0 %v2543_v60  ;;  %1410 = vmatpush.msrb.mxu1 %v3002_v2 }
 0x435   : > { %v1261_v38 = vpop.f32.mrf.mxu0  ;;  %v1290_v39 = vpop.f32.mrf.mxu1 }
 0x436   : > { %1768 = vmatmul.msk.f32.vlgmr.msra.gmra.mxu2 %vm1048_vm1, %v1290_v39  ;;  %1770 = vmatmul.msk.f32.vlgmr.msra.gmra.mxu3 %vm1048_vm1, %v1261_v38 }
 0x43d   : > { %v1264_v43 = vpop.f32.mrf.mxu0  ;;  %v1293_v40 = vpop.f32.mrf.mxu1 }
 0x43e   : > { %1769 = vmatmul.msk.f32.gmra.mxu2 %vm1048_vm1, %v1293_v40  ;;  %1771 = vmatmul.msk.f32.gmra.mxu3 %vm1048_vm1, %v1264_v43 }
 0x4b9   : > { %v1319_v0 = vpop.f32.mrf.mxu2  ;;  %v1348_v1 = vpop.f32.mrf.mxu3 }
 0x4ba   : > { %v1349_v41 = vadd.f32 %v1348_v1, %v1319_v0 }
 0x4bc   : > { %1772 = vmatmul.msk.f32.vlgmr.msrb.gmra.mxu0 %vm1048_vm1, %v1349_v41  ;;  %v1354_v46 = vmul.f32 %v1349_v41, %v2968_v30 }
 0x4c1   : > { %v1322_v60 = vpop.f32.mrf.mxu2  ;;  %v1351_v42 = vpop.f32.mrf.mxu3 }
 0x4c2   : > { %v1352_v44 = vadd.f32 %v1351_v42, %v1322_v60 }
 0x4c4   : > { %1773 = vmatmul.msk.f32.gmra.mxu0 %vm1048_vm1, %v1352_v44  ;;  %v1355_v53 = vmul.f32 %v1352_v44, %v2965_v24  ;;  %v3004_v24 = vld [vmem:[#allocation21_spill] sm:$0xff] }
 0x539   : > { %v1379_v45 = vpop.f32.mrf.mxu0 }
 0x53a   : > { %v1385_v47 = vmul.f32 %v1379_v45, %v2966_v26  ;;  %v3003_v26 = vld [vmem:[#allocation17_spill] sm:$0xff] }
 0x53c   : > { %v1387_v48 = vadd.f32 %v1385_v47, %v1354_v46 }
 0x53e   : > { %1774 = vmatmul.msk.f32.vlgmr.msrb.gmra.mxu1 %vm1048_vm1, %v1387_v48  ;;  %1776 = vmatmul.msk.f32.vlgmr.msrb.gmra.mxu2 %vm1048_vm1, %v1387_v48 }
 0x541   : > { %v1382_v49 = vpop.f32.mrf.mxu0 }
 0x542   : > { %v1386_v54 = vmul.f32 %v1382_v49, %v2967_v28  ;;  %v3005_v28 = vld [vmem:[#allocation22_spill] sm:$0xff] }
 0x544   : > { %v1388_v55 = vadd.f32 %v1386_v54, %v1355_v53 }
 0x546   : > { %1775 = vmatmul.msk.f32.gmra.mxu1 %vm1048_vm1, %v1388_v55  ;;  %1777 = vmatmul.msk.f32.gmra.mxu2 %vm1048_vm1, %v1388_v55 }
 0x5bb   : > { %v1412_v58 = vpop.f32.mrf.mxu1 }
 0x5c1   : > { %v1435_v59 = vpop.f32.mrf.mxu2 }
 0x5c3   : > { %v1415_v30 = vpop.f32.mrf.mxu1 }
 0x5c4   : > { %1508 = vmatpush.msra.mxu0 %v1415_v30 }
 0x5c6   : > { %1509 = vmatpush.msra.mxu0 %v1412_v58 }
 0x5c7   : > { %1782 = vmatmul.msk.f32.vlgmr.msra.gmra.mxu0 %vm1082_vm2, %v3003_v26 }
 0x5c9   : > { %v1438_v61 = vpop.f32.mrf.mxu2 }
 0x5ca   : > { %1467 = vmatpush.msra.mxu2 %v1438_v61  ;;  %1802 = vmatpush.msrb.mxu3 %v1438_v61 }
 0x5cc   : > { %1468 = vmatpush.msra.mxu2 %v1435_v59  ;;  %1803 = vmatpush.msrb.mxu3 %v1435_v59 }
 0x5cd   : > { %1778 = vmatmul.msk.f32.vlgmr.msra.gmra.mxu2 %vm1082_vm2, %v3004_v24  ;;  %1779 = vmatmul.msk.f32.vlgmr.msrb.gmra.mxu3 %vm1082_vm2, %v3005_v28 }
 0x5cf   : > { %1783 = vmatmul.msk.f32.gmra.mxu0 %vm1082_vm2, %v3006_v62 }
 0x5d5   : > { %1780 = vmatmul.msk.f32.gmra.mxu3 %vm1082_vm2, %v3007_v63 }
 0x5d7   : > { %1784 = vmatmul.msk.f32.gmra.mxu0 %vm1082_vm2, %v3008_v3 }
 0x5dd   : > { %1781 = vmatmul.msk.f32.gmra.mxu3 %vm1082_vm2, %v3009_v4 }
 0x5df   : > { %1785 = vmatmul.msk.f32.gmra.mxu0 %vm1082_vm2, %v3010_v5 }
 0x644   : > { %v1511_v6 = vpop.f32.mrf.mxu0 }
 0x64c   : > { %v1514_v7 = vpop.f32.mrf.mxu0 }
 0x650   : > { %v1470_v8 = vpop.f32.mrf.mxu2  ;;  %v1473_v9 = vpop.f32.mrf.mxu3 }
 0x651   : > { %v1512_v10 = vadd.f32 %v1511_v6, %v1470_v8  ;;  %v1515_v11 = vadd.f32 %v1514_v7, %v1473_v9 }
 0x653   : > { %1523 = vst [vmem:[%s2122_s25] sm:$0xff] %v1512_v10  ;;  %v1527_v12 = vmul.f32 0.01, %v1512_v10  ;;  %v1528_v13 = vmul.f32 0.01, %v1515_v11 }
 0x654   : > { %1524 = vst [vmem:[%s2122_s25 + $0x8] sm:$0xff] %v1515_v11  ;;  %v1517_v14 = vpop.f32.mrf.mxu0 }
 0x655   : > { %v1531_v15 = vsub.f32 %v2604_v21, %v1527_v12  ;;  %v1532_v16 = vsub.f32 %v2598_v23, %v1528_v13 }
 0x657   : > { %1535 = vst [vmem:[#allocation2 + $0x10] sm:$0xff] %v1531_v15 }
 0x658   : > { %1536 = vst [vmem:[#allocation2] sm:$0xff] %v1532_v16  ;;  %v1476_v17 = vpop.f32.mrf.mxu3 }
 0x659   : > { %v1518_v18 = vadd.f32 %v1517_v14, %v1476_v17 }
 0x65b   : > { %1525 = vst [vmem:[%s2122_s25 + $0x10] sm:$0xff] %v1518_v18  ;;  %v1529_v19 = vmul.f32 0.01, %v1518_v18 }
 0x65c   : > { %v1520_v21 = vpop.f32.mrf.mxu0 }
 0x65d   : > { %v1533_v20 = vsub.f32 %v2594_v52, %v1529_v19 }
 0x65f   : > { %1537 = vst [vmem:[#allocation2 + $0x18] sm:$0xff] %v1533_v20 }
 0x660   : > { %v1479_v23 = vpop.f32.mrf.mxu3 }
 0x661   : > { %v1521_v22 = vadd.f32 %v1520_v21, %v1479_v23 }
 0x663   : > { %1526 = vst [vmem:[%s2122_s25 + $0x18] sm:$0xff] %v1521_v22  ;;  %v1530_v25 = vmul.f32 0.01, %v1521_v22 }
 0x664   : > { %1875 = shalt.err (!%p1872_p7)
}
 0x665   : > { %s1916_s25 = smov 128   ;;  %s1917_s15 = smov 8   ;;  %v1534_v52 = vsub.f32 %v2592_v57, %v1530_v25 }
 0x666   : > { %1806 = dma.vmem_to_hbm [thread:$0]  (%p2066_p5), %s1553_s18, 512, %s1555_s23, %s1540_s1, %s1916_s25, %s1916_s25, %s1917_s15  }
 0x667   : > { %1538 = vst [vmem:[#allocation2 + $0x8] sm:$0xff] %v1534_v52 }
 0x668 PF: > { %s3016_s3 = sld [smem:[#allocation12_spill]] }
 0x669   : > { %s3017_s13 = sld [smem:[#allocation9_spill]] }
 0x66e   : > { %p1813_p8 = scmp.ge.s32.totalorder %s3016_s3, 2 }
 0x66f   : > { %s1569_s0 = sand.u32 1, %s3017_s13  }
 0x670   : > { %p1809_p9 = pnand %p1813_p8, %p2070_p6  ;;  %s1570_s2 = scalar_lea.sflag [#allocation5], %s1569_s0 }
 0x672   : > { %p1810_p10 = pneg %p1809_p9 }
 0x674   : > { %1897 = dma.done.wait (%p1810_p10), %s1570_s2, 512  }
 0x675   : > { %1899 = vsyncadd (%p1810_p10), %s1570_s2, 4294966784  ;;  %s3019_s27 = sld [smem:[#allocation13_spill]] }
 0x676   : > { %s3020_s2 = sld [smem:[#allocation10_spill]] }
 0x677   : > { %s3021_s25 = sld [smem:[#allocation11_spill]] }
 0x678   : > { %s3022_s26 = sld [smem:[#allocation14_spill]] }
 0x67b   : > { %p31_p5 = scmp.ge.s32.totalorder %s3019_s27, 6  }
 0x67d   :  { %33 = sbr.rel (!%p31_p5) target bundleno = 20 (0x14), region = 190 }
 0x682   :  { %1576 = vsyncpa [#allocation5], 1 }
 0x683   :  { %1578 = vsyncpa [#allocation5 + $0x1], 1 }
 0x684   :  { %1579 = vsyncmov [#allocation3] }
 0x687   :  { %s1580_s0 = vpop.sfrf %1579 }
 0x688   :  { %p1791_p6 = scmp.ne.s32.totalorder %s1580_s0, 0 }
 0x68a   :  { %1584 = shalt.err (%p1791_p6)  }

</bundles_post_ra>
